<compile_context>
chip_gen: v6e
topology: v6e:2x2x1
jax: 0.10.0
libtpu: 0.0.40
codegen_flags: <defaults>
</compile_context>

<pallas_src>
import jax
import jax.numpy as jnp
from jax.experimental import pallas as pl
from jax.experimental.pallas import tpu as pltpu

BN_EPS = 1e-5
LANE = 128  # lane-dense channel padding target


def _round_up(x, m):
    return (x + m - 1) // m * m


def _fold_bn(bn):
    scale = bn["gamma"] / jnp.sqrt(bn["var"] + BN_EPS)
    shift = bn["beta"] - bn["mean"] * scale
    return scale, shift


def _pad_vec(v, target):
    return jnp.pad(v, (0, target - v.shape[0]))


def _prep_conv3x3(w_oihw, scale, cin_p, cout_p):
    """OIHW 3x3 weight -> (9*cin_p, cout_p) matmul weight with BN scale folded."""
    cout, cin = w_oihw.shape[0], w_oihw.shape[1]
    w = jnp.transpose(w_oihw, (2, 3, 1, 0))            # (3, 3, cin, cout)
    w = w * scale[None, None, None, :]                 # fold BN scale per out-channel
    w = jnp.pad(w, ((0, 0), (0, 0), (0, cin_p - cin), (0, cout_p - cout)))
    return w.reshape(9 * cin_p, cout_p)                # row = (dy*3+dx)*cin_p + ci


def _parity_planes(xpad, stride, hout, wout):
    """Split padded NHWC input into stride-parity planes.

    Returns (n, stride*stride, HP, WP, c) so tap (dy, dx) of the strided 3x3
    conv is a *contiguous* slice of plane (dy % s, dx % s) at offset
    (dy // s, dx // s).  Total bytes ~= bytes of xpad (no duplication).
    """
    s = stride
    HP = hout + (3 - 1) // s
    WP = wout + (3 - 1) // s
    planes = []
    for p in range(s):
        for q in range(s):
            pq = xpad[:, p::s, q::s, :][:, :HP, :WP, :]
            ph, pw = HP - pq.shape[1], WP - pq.shape[2]
            if ph or pw:
                pq = jnp.pad(pq, ((0, 0), (0, ph), (0, pw), (0, 0)))
            planes.append(pq)
    return jnp.stack(planes, axis=1), HP, WP


def _make_resblock_kernel(hout, wout, cin_p, cout_p, stride, use_shortcut):
    s = stride

    def kernel(*refs):
        if use_shortcut:
            (pln_ref, w1_ref, w2_ref, wsc_ref, b1_ref, b2_ref, bsc_ref,
             o_ref, y1pad) = refs
        else:
            (pln_ref, w1_ref, w2_ref, b1_ref, b2_ref, o_ref, y1pad) = refs

        # ---- conv1: gather the 9 stride-s taps (contiguous slices of the
        # parity planes) and run a single fused K = 9*cin matmul.  BN1 scale is
        # folded into w1; only the shift + ReLU remain.
        taps = []
        for dy in range(3):
            for dx in range(3):
                pi = (dy % s) * s + (dx % s)
                oy, ox = dy // s, dx // s
                taps.append(pln_ref[pi, oy:oy + hout, ox:ox + wout, :])
        p1 = jnp.concatenate(taps, axis=-1).reshape(hout * wout, 9 * cin_p)
        y1 = jnp.maximum(
            jnp.dot(p1, w1_ref[...], preferred_element_type=jnp.float32)
            + b1_ref[...],
            0.0)

        # ---- conv2 (3x3, stride 1, pad 1): write y1 into the interior of the
        # halo scratch, build the 9-tap slab, single K = 9*cout matmul + BN2
        # shift.  Only the BORDER is zeroed (interior is fully overwritten
        # every step); re-zeroed each step so per-core scratch stays correct
        # under "parallel" batch sharding.
        zrow = jnp.zeros((1, wout + 2, cout_p), jnp.float32)
        zcol = jnp.zeros((hout + 2, 1, cout_p), jnp.float32)
        y1pad[0:1, :, :] = zrow
        y1pad[hout + 1:hout + 2, :, :] = zrow
        y1pad[:, 0:1, :] = zcol
        y1pad[:, wout + 1:wout + 2, :] = zcol
        y1pad[1:hout + 1, 1:wout + 1, :] = y1.reshape(hout, wout, cout_p)

        taps2 = [y1pad[dy:dy + hout, dx:dx + wout, :]
                 for dy in range(3) for dx in range(3)]
        p2 = jnp.concatenate(taps2, axis=-1).reshape(hout * wout, 9 * cout_p)
        y2 = (jnp.dot(p2, w2_ref[...], preferred_element_type=jnp.float32)
              + b2_ref[...])

        # ---- shortcut: the center tap (dy = dx = 1) is exactly x[::s, ::s]
        # (== x when s == 1), so no extra HBM read is needed.
        ctr = taps[4].reshape(hout * wout, cin_p)
        if use_shortcut:
            sc = (jnp.dot(ctr, wsc_ref[...], preferred_element_type=jnp.float32)
                  + bsc_ref[...])
        else:
            sc = ctr  # identity path: cin == cout, stride == 1

        o_ref[...] = jnp.maximum(y2 + sc, 0.0).astype(o_ref.dtype)

    return kernel


def residual_block(x_nchw, params, stride):
    n, cin, h, w = x_nchw.shape
    cout = params["conv1_w"].shape[0]
    use_shortcut = (stride != 1) or (cin != cout)
    hout = (h + 2 - 3) // stride + 1
    wout = (w + 2 - 3) // stride + 1
    cin_p = _round_up(cin, LANE)
    cout_p = _round_up(cout, LANE)

    # layout glue: NCHW -> NHWC, lane-pad channels, spatial zero-pad, parity split
    x = jnp.transpose(x_nchw, (0, 2, 3, 1)).astype(jnp.float32)
    x = jnp.pad(x, ((0, 0), (0, 0), (0, 0), (0, cin_p - cin)))
    xpad = jnp.pad(x, ((0, 0), (1, 1), (1, 1), (0, 0)))
    planes, HP, WP = _parity_planes(xpad, stride, hout, wout)

    # fold BN scales into weights; keep only per-channel shifts
    s1, sh1 = _fold_bn(params["bn1"])
    s2, sh2 = _fold_bn(params["bn2"])
    w1 = _prep_conv3x3(params["conv1_w"], s1, cin_p, cout_p)
    w2 = _prep_conv3x3(params["conv2_w"], s2, cout_p, cout_p)
    b1 = _pad_vec(sh1, cout_p).reshape(1, cout_p)
    b2 = _pad_vec(sh2, cout_p).reshape(1, cout_p)

    plane_spec = pl.BlockSpec((None, stride * stride, HP, WP, cin_p),
                              lambda b: (b, 0, 0, 0, 0))
    w1_spec = pl.BlockSpec((9 * cin_p, cout_p), lambda b: (0, 0))
    w2_spec = pl.BlockSpec((9 * cout_p, cout_p), lambda b: (0, 0))
    vec_spec = pl.BlockSpec((1, cout_p), lambda b: (0, 0))

    if use_shortcut:
        ssc, shsc = _fold_bn(params["bn_sc"])
        wsc = jnp.transpose(params["sc_w"][:, :, 0, 0], (1, 0)) * ssc[None, :]
        wsc = jnp.pad(wsc, ((0, cin_p - cin), (0, cout_p - cout)))
        bsc = _pad_vec(shsc, cout_p).reshape(1, cout_p)
        args = (planes, w1, w2, wsc, b1, b2, bsc)
        in_specs = [plane_spec, w1_spec, w2_spec,
                    pl.BlockSpec((cin_p, cout_p), lambda b: (0, 0)),
                    vec_spec, vec_spec, vec_spec]
    else:
        args = (planes, w1, w2, b1, b2)
        in_specs = [plane_spec, w1_spec, w2_spec, vec_spec, vec_spec]

    kernel = _make_resblock_kernel(hout, wout, cin_p, cout_p, stride, use_shortcut)

    out2d = pl.pallas_call(
        kernel,
        out_shape=jax.ShapeDtypeStruct((n, hout * wout, cout_p), jnp.float32),
        grid=(n,),
        in_specs=in_specs,
        out_specs=pl.BlockSpec((None, hout * wout, cout_p), lambda b: (b, 0, 0)),
        scratch_shapes=[pltpu.VMEM((hout + 2, wout + 2, cout_p), jnp.float32)],
        compiler_params=pltpu.CompilerParams(
            dimension_semantics=("parallel",)),
    )(*args)

    out = out2d.reshape(n, hout, wout, cout_p)[..., :cout]
    return jnp.transpose(out, (0, 3, 1, 2))  # back to NCHW


def residual_block_ref(x_nchw, params, stride):
    """Pure-JAX reference (lax.conv) for correctness checking."""
    x = jnp.transpose(x_nchw, (0, 2, 3, 1)).astype(jnp.float32)

    def conv(inp, w_oihw, s, pad):
        w_hwio = jnp.transpose(w_oihw, (2, 3, 1, 0))
        return jax.lax.conv_general_dilated(
            inp, w_hwio, (s, s), [(pad, pad), (pad, pad)],
            dimension_numbers=("NHWC", "HWIO", "NHWC"))

    def bn(inp, p):
        s, b = _fold_bn(p)
        return inp * s + b

    out = jnp.maximum(bn(conv(x, params["conv1_w"], stride, 1), params["bn1"]), 0.0)
    out = bn(conv(out, params["conv2_w"], 1, 1), params["bn2"])
    cin, cout = x.shape[-1], params["conv1_w"].shape[0]
    if stride != 1 or cin != cout:
        sc = bn(conv(x, params["sc_w"], stride, 0), params["bn_sc"])
    else:
        sc = x
    out = jnp.maximum(out + sc, 0.0)
    return jnp.transpose(out, (0, 3, 1, 2))


def init_params(key, cin, cout, stride):
    ks = jax.random.split(key, 6)

    def bn_params(k):
        k1, k2, k3, k4 = jax.random.split(k, 4)
        return dict(
            gamma=jax.random.uniform(k1, (cout,), jnp.float32, 0.5, 1.5),
            beta=jax.random.normal(k2, (cout,), jnp.float32) * 0.1,
            mean=jax.random.normal(k3, (cout,), jnp.float32) * 0.1,
            var=jax.random.uniform(k4, (cout,), jnp.float32, 0.5, 1.5),
        )

    p = dict(
        conv1_w=jax.random.normal(ks[0], (cout, cin, 3, 3), jnp.float32) * 0.2,
        bn1=bn_params(ks[1]),
        conv2_w=jax.random.normal(ks[2], (cout, cout, 3, 3), jnp.float32) * 0.2,
        bn2=bn_params(ks[3]),
    )
    if stride != 1 or cin != cout:
        p["sc_w"] = jax.random.normal(ks[4], (cout, cin, 1, 1), jnp.float32) * 0.2
        p["bn_sc"] = bn_params(ks[5])
    return p


if __name__ == "__main__":
    key = jax.random.PRNGKey(0)
    k1, k2, k3, k4 = jax.random.split(key, 4)

    # Case 1: projection-shortcut path (stride 2, channel expansion 4 -> 8).
    N, CIN, H, W, COUT, STRIDE = 2, 4, 16, 16, 8, 2
    x1 = jax.random.normal(k1, (N, CIN, H, W), jnp.float32)
    params1 = init_params(k2, CIN, COUT, STRIDE)
    out1 = jax.block_until_ready(residual_block(x1, params1, STRIDE))
    ref1 = residual_block_ref(x1, params1, STRIDE)
    assert out1.shape == (N, COUT, H // STRIDE, W // STRIDE), out1.shape
    err1 = float(jnp.max(jnp.abs(out1 - ref1)))

    # Case 2: identity-shortcut path (stride 1, same channels).
    x2 = jax.random.normal(k3, (N, CIN, H, W), jnp.float32)
    params2 = init_params(k4, CIN, CIN, 1)
    out2 = jax.block_until_ready(residual_block(x2, params2, 1))
    ref2 = residual_block_ref(x2, params2, 1)
    assert out2.shape == (N, CIN, H, W), out2.shape
    err2 = float(jnp.max(jnp.abs(out2 - ref2)))

    if err1 > 1e-3 or err2 > 1e-3:
        raise AssertionError(
            f"Pallas kernel mismatch vs reference: max abs errs {err1}, {err2}")
    print("KERNEL_OK")
</pallas_src>

<mosaic_0001>
module attributes {stable_mosaic.version = 11 : i64} {
  func.func @kernel(%arg0: i32, %arg1: memref<1x4x9x9x128xf32, #tpu.memory_space<vmem>>, %arg2: memref<1152x128xf32, #tpu.memory_space<vmem>>, %arg3: memref<1152x128xf32, #tpu.memory_space<vmem>>, %arg4: memref<128x128xf32, #tpu.memory_space<vmem>>, %arg5: memref<1x128xf32, #tpu.memory_space<vmem>>, %arg6: memref<1x128xf32, #tpu.memory_space<vmem>>, %arg7: memref<1x128xf32, #tpu.memory_space<vmem>>, %arg8: memref<1x64x128xf32, #tpu.memory_space<vmem>>, %arg9: memref<10x10x128xf32, #tpu.memory_space<vmem>>) attributes {dimension_semantics = [#tpu.dimension_semantics<parallel>], iteration_bounds = array<i64: 2>, scalar_prefetch = 0 : i64, scratch_operands = 1 : i64, tpu.core_type = #tpu.core_type<tc>, window_params = [{transform_indices = @transform_0, window_bounds = array<i64: 1, 4, 9, 9, 128>}, {pipeline_mode = #tpu.pipeline_mode<synchronous>, transform_indices = @transform_1, window_bounds = array<i64: 1152, 128>}, {pipeline_mode = #tpu.pipeline_mode<synchronous>, transform_indices = @transform_2, window_bounds = array<i64: 1152, 128>}, {pipeline_mode = #tpu.pipeline_mode<synchronous>, transform_indices = @transform_3, window_bounds = array<i64: 128, 128>}, {pipeline_mode = #tpu.pipeline_mode<synchronous>, transform_indices = @transform_4, window_bounds = array<i64: 1, 128>}, {pipeline_mode = #tpu.pipeline_mode<synchronous>, transform_indices = @transform_5, window_bounds = array<i64: 1, 128>}, {pipeline_mode = #tpu.pipeline_mode<synchronous>, transform_indices = @transform_6, window_bounds = array<i64: 1, 128>}, {transform_indices = @transform_7, window_bounds = array<i64: 1, 64, 128>}]} {
    %c0 = arith.constant 0 : index
    %c0_0 = arith.constant 0 : index
    %c0_1 = arith.constant 0 : index
    %c0_2 = arith.constant 0 : index
    %c0_3 = arith.constant 0 : index
    %0 = vector.load %arg1[%c0, %c0_0, %c0_1, %c0_2, %c0_3] : memref<1x4x9x9x128xf32, #tpu.memory_space<vmem>>, vector<1x1x8x8x128xf32>
    %1 = vector.shape_cast %0 : vector<1x1x8x8x128xf32> to vector<8x8x128xf32>
    %c0_4 = arith.constant 0 : index
    %c1 = arith.constant 1 : index
    %c0_5 = arith.constant 0 : index
    %c0_6 = arith.constant 0 : index
    %c0_7 = arith.constant 0 : index
    %2 = vector.load %arg1[%c0_4, %c1, %c0_5, %c0_6, %c0_7] : memref<1x4x9x9x128xf32, #tpu.memory_space<vmem>>, vector<1x1x8x8x128xf32>
    %3 = vector.shape_cast %2 : vector<1x1x8x8x128xf32> to vector<8x8x128xf32>
    %c0_8 = arith.constant 0 : index
    %c0_9 = arith.constant 0 : index
    %c0_10 = arith.constant 0 : index
    %c1_11 = arith.constant 1 : index
    %c0_12 = arith.constant 0 : index
    %4 = vector.load %arg1[%c0_8, %c0_9, %c0_10, %c1_11, %c0_12] : memref<1x4x9x9x128xf32, #tpu.memory_space<vmem>>, vector<1x1x8x8x128xf32>
    %5 = vector.shape_cast %4 : vector<1x1x8x8x128xf32> to vector<8x8x128xf32>
    %c0_13 = arith.constant 0 : index
    %c2 = arith.constant 2 : index
    %c0_14 = arith.constant 0 : index
    %c0_15 = arith.constant 0 : index
    %c0_16 = arith.constant 0 : index
    %6 = vector.load %arg1[%c0_13, %c2, %c0_14, %c0_15, %c0_16] : memref<1x4x9x9x128xf32, #tpu.memory_space<vmem>>, vector<1x1x8x8x128xf32>
    %7 = vector.shape_cast %6 : vector<1x1x8x8x128xf32> to vector<8x8x128xf32>
    %c0_17 = arith.constant 0 : index
    %c3 = arith.constant 3 : index
    %c0_18 = arith.constant 0 : index
    %c0_19 = arith.constant 0 : index
    %c0_20 = arith.constant 0 : index
    %8 = vector.load %arg1[%c0_17, %c3, %c0_18, %c0_19, %c0_20] : memref<1x4x9x9x128xf32, #tpu.memory_space<vmem>>, vector<1x1x8x8x128xf32>
    %9 = vector.shape_cast %8 : vector<1x1x8x8x128xf32> to vector<8x8x128xf32>
    %c0_21 = arith.constant 0 : index
    %c2_22 = arith.constant 2 : index
    %c0_23 = arith.constant 0 : index
    %c1_24 = arith.constant 1 : index
    %c0_25 = arith.constant 0 : index
    %10 = vector.load %arg1[%c0_21, %c2_22, %c0_23, %c1_24, %c0_25] : memref<1x4x9x9x128xf32, #tpu.memory_space<vmem>>, vector<1x1x8x8x128xf32>
    %11 = vector.shape_cast %10 : vector<1x1x8x8x128xf32> to vector<8x8x128xf32>
    %c0_26 = arith.constant 0 : index
    %c0_27 = arith.constant 0 : index
    %c1_28 = arith.constant 1 : index
    %c0_29 = arith.constant 0 : index
    %c0_30 = arith.constant 0 : index
    %12 = vector.load %arg1[%c0_26, %c0_27, %c1_28, %c0_29, %c0_30] : memref<1x4x9x9x128xf32, #tpu.memory_space<vmem>>, vector<1x1x8x8x128xf32>
    %13 = vector.shape_cast %12 : vector<1x1x8x8x128xf32> to vector<8x8x128xf32>
    %c0_31 = arith.constant 0 : index
    %c1_32 = arith.constant 1 : index
    %c1_33 = arith.constant 1 : index
    %c0_34 = arith.constant 0 : index
    %c0_35 = arith.constant 0 : index
    %14 = vector.load %arg1[%c0_31, %c1_32, %c1_33, %c0_34, %c0_35] : memref<1x4x9x9x128xf32, #tpu.memory_space<vmem>>, vector<1x1x8x8x128xf32>
    %15 = vector.shape_cast %14 : vector<1x1x8x8x128xf32> to vector<8x8x128xf32>
    %c0_36 = arith.constant 0 : index
    %c0_37 = arith.constant 0 : index
    %c1_38 = arith.constant 1 : index
    %c1_39 = arith.constant 1 : index
    %c0_40 = arith.constant 0 : index
    %16 = vector.load %arg1[%c0_36, %c0_37, %c1_38, %c1_39, %c0_40] : memref<1x4x9x9x128xf32, #tpu.memory_space<vmem>>, vector<1x1x8x8x128xf32>
    %17 = vector.shape_cast %16 : vector<1x1x8x8x128xf32> to vector<8x8x128xf32>
    %18 = tpu.concatenate %1, %3, %5, %7, %9, %11, %13, %15, %17 in 2 : vector<8x8x128xf32>, vector<8x8x128xf32>, vector<8x8x128xf32>, vector<8x8x128xf32>, vector<8x8x128xf32>, vector<8x8x128xf32>, vector<8x8x128xf32>, vector<8x8x128xf32>, vector<8x8x128xf32> -> vector<8x8x1152xf32>
    %19 = vector.shape_cast %18 : vector<8x8x1152xf32> to vector<64x1152xf32>
    %c0_41 = arith.constant 0 : index
    %c0_42 = arith.constant 0 : index
    %20 = vector.load %arg2[%c0_41, %c0_42] : memref<1152x128xf32, #tpu.memory_space<vmem>>, vector<1152x128xf32>
    %cst = arith.constant dense<0.000000e+00> : vector<64x128xf32>
    %21 = tpu.matmul %19, %20, %cst {dimension_numbers = #tpu.dot_dimension_numbers<[1], [0], [0], [1], [0, 0, 1, 1], [], []>} : vector<64x1152xf32>, vector<1152x128xf32>, vector<64x128xf32> -> vector<64x128xf32>
    %c0_43 = arith.constant 0 : index
    %c0_44 = arith.constant 0 : index
    %22 = vector.load %arg5[%c0_43, %c0_44] : memref<1x128xf32, #tpu.memory_space<vmem>>, vector<1x128xf32>
    %23 = vector.broadcast %22 : vector<1x128xf32> to vector<64x128xf32>
    %24 = arith.addf %21, %23 : vector<64x128xf32>
    %cst_45 = arith.constant 0.000000e+00 : f32
    %25 = vector.broadcast %cst_45 : f32 to vector<64x128xf32>
    %26 = arith.maximumf %24, %25 : vector<64x128xf32>
    %cst_46 = arith.constant 0.000000e+00 : f32
    %27 = vector.broadcast %cst_46 : f32 to vector<1x10x128xf32>
    %cst_47 = arith.constant 0.000000e+00 : f32
    %28 = vector.broadcast %cst_47 : f32 to vector<10x1x128xf32>
    %c0_48 = arith.constant 0 : index
    %c0_49 = arith.constant 0 : index
    %c0_50 = arith.constant 0 : index
    %29 = vector.load %arg9[%c0_48, %c0_49, %c0_50] : memref<10x10x128xf32, #tpu.memory_space<vmem>>, vector<1x10x128xf32>
    tpu.vector_store %arg9[%c0_48, %c0_49, %c0_50], %27 {strides = array<i32>} : memref<10x10x128xf32, #tpu.memory_space<vmem>>, vector<1x10x128xf32>,
    %c9 = arith.constant 9 : index
    %c0_51 = arith.constant 0 : index
    %c0_52 = arith.constant 0 : index
    %30 = vector.load %arg9[%c9, %c0_51, %c0_52] : memref<10x10x128xf32, #tpu.memory_space<vmem>>, vector<1x10x128xf32>
    tpu.vector_store %arg9[%c9, %c0_51, %c0_52], %27 {strides = array<i32>} : memref<10x10x128xf32, #tpu.memory_space<vmem>>, vector<1x10x128xf32>,
    %c0_53 = arith.constant 0 : index
    %c0_54 = arith.constant 0 : index
    %c0_55 = arith.constant 0 : index
    %31 = vector.load %arg9[%c0_53, %c0_54, %c0_55] : memref<10x10x128xf32, #tpu.memory_space<vmem>>, vector<10x1x128xf32>
    tpu.vector_store %arg9[%c0_53, %c0_54, %c0_55], %28 {strides = array<i32>} : memref<10x10x128xf32, #tpu.memory_space<vmem>>, vector<10x1x128xf32>,
    %c0_56 = arith.constant 0 : index
    %c9_57 = arith.constant 9 : index
    %c0_58 = arith.constant 0 : index
    %32 = vector.load %arg9[%c0_56, %c9_57, %c0_58] : memref<10x10x128xf32, #tpu.memory_space<vmem>>, vector<10x1x128xf32>
    tpu.vector_store %arg9[%c0_56, %c9_57, %c0_58], %28 {strides = array<i32>} : memref<10x10x128xf32, #tpu.memory_space<vmem>>, vector<10x1x128xf32>,
    %33 = vector.shape_cast %26 : vector<64x128xf32> to vector<8x8x128xf32>
    %c1_59 = arith.constant 1 : index
    %c1_60 = arith.constant 1 : index
    %c0_61 = arith.constant 0 : index
    %34 = vector.load %arg9[%c1_59, %c1_60, %c0_61] : memref<10x10x128xf32, #tpu.memory_space<vmem>>, vector<8x8x128xf32>
    tpu.vector_store %arg9[%c1_59, %c1_60, %c0_61], %33 {strides = array<i32>} : memref<10x10x128xf32, #tpu.memory_space<vmem>>, vector<8x8x128xf32>,
    %c0_62 = arith.constant 0 : index
    %c0_63 = arith.constant 0 : index
    %c0_64 = arith.constant 0 : index
    %35 = vector.load %arg9[%c0_62, %c0_63, %c0_64] : memref<10x10x128xf32, #tpu.memory_space<vmem>>, vector<8x8x128xf32>
    %c0_65 = arith.constant 0 : index
    %c1_66 = arith.constant 1 : index
    %c0_67 = arith.constant 0 : index
    %36 = vector.load %arg9[%c0_65, %c1_66, %c0_67] : memref<10x10x128xf32, #tpu.memory_space<vmem>>, vector<8x8x128xf32>
    %c0_68 = arith.constant 0 : index
    %c2_69 = arith.constant 2 : index
    %c0_70 = arith.constant 0 : index
    %37 = vector.load %arg9[%c0_68, %c2_69, %c0_70] : memref<10x10x128xf32, #tpu.memory_space<vmem>>, vector<8x8x128xf32>
    %c1_71 = arith.constant 1 : index
    %c0_72 = arith.constant 0 : index
    %c0_73 = arith.constant 0 : index
    %38 = vector.load %arg9[%c1_71, %c0_72, %c0_73] : memref<10x10x128xf32, #tpu.memory_space<vmem>>, vector<8x8x128xf32>
    %c1_74 = arith.constant 1 : index
    %c1_75 = arith.constant 1 : index
    %c0_76 = arith.constant 0 : index
    %39 = vector.load %arg9[%c1_74, %c1_75, %c0_76] : memref<10x10x128xf32, #tpu.memory_space<vmem>>, vector<8x8x128xf32>
    %c1_77 = arith.constant 1 : index
    %c2_78 = arith.constant 2 : index
    %c0_79 = arith.constant 0 : index
    %40 = vector.load %arg9[%c1_77, %c2_78, %c0_79] : memref<10x10x128xf32, #tpu.memory_space<vmem>>, vector<8x8x128xf32>
    %c2_80 = arith.constant 2 : index
    %c0_81 = arith.constant 0 : index
    %c0_82 = arith.constant 0 : index
    %41 = vector.load %arg9[%c2_80, %c0_81, %c0_82] : memref<10x10x128xf32, #tpu.memory_space<vmem>>, vector<8x8x128xf32>
    %c2_83 = arith.constant 2 : index
    %c1_84 = arith.constant 1 : index
    %c0_85 = arith.constant 0 : index
    %42 = vector.load %arg9[%c2_83, %c1_84, %c0_85] : memref<10x10x128xf32, #tpu.memory_space<vmem>>, vector<8x8x128xf32>
    %c2_86 = arith.constant 2 : index
    %c2_87 = arith.constant 2 : index
    %c0_88 = arith.constant 0 : index
    %43 = vector.load %arg9[%c2_86, %c2_87, %c0_88] : memref<10x10x128xf32, #tpu.memory_space<vmem>>, vector<8x8x128xf32>
    %44 = tpu.concatenate %35, %36, %37, %38, %39, %40, %41, %42, %43 in 2 : vector<8x8x128xf32>, vector<8x8x128xf32>, vector<8x8x128xf32>, vector<8x8x128xf32>, vector<8x8x128xf32>, vector<8x8x128xf32>, vector<8x8x128xf32>, vector<8x8x128xf32>, vector<8x8x128xf32> -> vector<8x8x1152xf32>
    %45 = vector.shape_cast %44 : vector<8x8x1152xf32> to vector<64x1152xf32>
    %c0_89 = arith.constant 0 : index
    %c0_90 = arith.constant 0 : index
    %46 = vector.load %arg3[%c0_89, %c0_90] : memref<1152x128xf32, #tpu.memory_space<vmem>>, vector<1152x128xf32>
    %cst_91 = arith.constant dense<0.000000e+00> : vector<64x128xf32>
    %47 = tpu.matmul %45, %46, %cst_91 {dimension_numbers = #tpu.dot_dimension_numbers<[1], [0], [0], [1], [0, 0, 1, 1], [], []>} : vector<64x1152xf32>, vector<1152x128xf32>, vector<64x128xf32> -> vector<64x128xf32>
    %c0_92 = arith.constant 0 : index
    %c0_93 = arith.constant 0 : index
    %48 = vector.load %arg6[%c0_92, %c0_93] : memref<1x128xf32, #tpu.memory_space<vmem>>, vector<1x128xf32>
    %49 = vector.broadcast %48 : vector<1x128xf32> to vector<64x128xf32>
    %50 = arith.addf %47, %49 : vector<64x128xf32>
    %51 = vector.shape_cast %9 : vector<8x8x128xf32> to vector<64x128xf32>
    %c0_94 = arith.constant 0 : index
    %c0_95 = arith.constant 0 : index
    %52 = vector.load %arg4[%c0_94, %c0_95] : memref<128x128xf32, #tpu.memory_space<vmem>>, vector<128x128xf32>
    %cst_96 = arith.constant dense<0.000000e+00> : vector<64x128xf32>
    %53 = tpu.matmul %51, %52, %cst_96 {dimension_numbers = #tpu.dot_dimension_numbers<[1], [0], [0], [1], [0, 0, 1, 1], [], []>} : vector<64x128xf32>, vector<128x128xf32>, vector<64x128xf32> -> vector<64x128xf32>
    %c0_97 = arith.constant 0 : index
    %c0_98 = arith.constant 0 : index
    %54 = vector.load %arg7[%c0_97, %c0_98] : memref<1x128xf32, #tpu.memory_space<vmem>>, vector<1x128xf32>
    %55 = vector.broadcast %54 : vector<1x128xf32> to vector<64x128xf32>
    %56 = arith.addf %53, %55 : vector<64x128xf32>
    %57 = arith.addf %50, %56 : vector<64x128xf32>
    %cst_99 = arith.constant 0.000000e+00 : f32
    %58 = vector.broadcast %cst_99 : f32 to vector<64x128xf32>
    %59 = arith.maximumf %57, %58 : vector<64x128xf32>
    %c0_100 = arith.constant 0 : index
    %c0_101 = arith.constant 0 : index
    %c0_102 = arith.constant 0 : index
    %60 = vector.load %arg8[%c0_100, %c0_101, %c0_102] : memref<1x64x128xf32, #tpu.memory_space<vmem>>, vector<1x64x128xf32>
    %61 = vector.shape_cast %60 : vector<1x64x128xf32> to vector<64x128xf32>
    %62 = vector.shape_cast %59 : vector<64x128xf32> to vector<1x64x128xf32>
    tpu.vector_store %arg8[%c0_100, %c0_101, %c0_102], %62 {strides = array<i32>} : memref<1x64x128xf32, #tpu.memory_space<vmem>>, vector<1x64x128xf32>,
    return
  }
  func.func @transform_0(%arg0: i32) -> (i32, i32, i32, i32, i32) {
    %c0_i32 = arith.constant 0 : i32
    %c0_i32_0 = arith.constant 0 : i32
    %c0_i32_1 = arith.constant 0 : i32
    %c0_i32_2 = arith.constant 0 : i32
    %c0_i32_3 = arith.constant 0 : i32
    return %arg0, %c0_i32, %c0_i32_0, %c0_i32_1, %c0_i32_2 : i32, i32, i32, i32, i32
  }
  func.func @transform_1(%arg0: i32) -> (i32, i32) {
    %c0_i32 = arith.constant 0 : i32
    %c0_i32_0 = arith.constant 0 : i32
    %c0_i32_1 = arith.constant 0 : i32
    return %c0_i32, %c0_i32_0 : i32, i32
  }
  func.func @transform_2(%arg0: i32) -> (i32, i32) {
    %c0_i32 = arith.constant 0 : i32
    %c0_i32_0 = arith.constant 0 : i32
    %c0_i32_1 = arith.constant 0 : i32
    return %c0_i32, %c0_i32_0 : i32, i32
  }
  func.func @transform_3(%arg0: i32) -> (i32, i32) {
    %c0_i32 = arith.constant 0 : i32
    %c0_i32_0 = arith.constant 0 : i32
    %c0_i32_1 = arith.constant 0 : i32
    return %c0_i32, %c0_i32_0 : i32, i32
  }
  func.func @transform_4(%arg0: i32) -> (i32, i32) {
    %c0_i32 = arith.constant 0 : i32
    %c0_i32_0 = arith.constant 0 : i32
    %c0_i32_1 = arith.constant 0 : i32
    return %c0_i32, %c0_i32_0 : i32, i32
  }
  func.func @transform_5(%arg0: i32) -> (i32, i32) {
    %c0_i32 = arith.constant 0 : i32
    %c0_i32_0 = arith.constant 0 : i32
    %c0_i32_1 = arith.constant 0 : i32
    return %c0_i32, %c0_i32_0 : i32, i32
  }
  func.func @transform_6(%arg0: i32) -> (i32, i32) {
    %c0_i32 = arith.constant 0 : i32
    %c0_i32_0 = arith.constant 0 : i32
    %c0_i32_1 = arith.constant 0 : i32
    return %c0_i32, %c0_i32_0 : i32, i32
  }
  func.func @transform_7(%arg0: i32) -> (i32, i32, i32) {
    %c0_i32 = arith.constant 0 : i32
    %c0_i32_0 = arith.constant 0 : i32
    %c0_i32_1 = arith.constant 0 : i32
    return %arg0, %c0_i32, %c0_i32_0 : i32, i32, i32
  }
}

</mosaic_0001>

<bundles_post_ra>
// kernel: tpu_custom_call.1
= control target key start
LH: loop header
LB: loop body
LE: loop exit
PB: predicated region body
PF: predicated region fallthrough
CT: control target
= control target key end

     0   :  { %12 = vsyncpa [#allocation4], 0  ;;  %s4191_s0 = inlined_call_operand.vmem [shape: f32[2,4,9,9,128], index: 0, kind: input, shape index: {}]   ;;  %s4192_s1 = inlined_call_operand.vmem [shape: f32[1152,128], index: 1, kind: input, shape index: {}]   ;;  %s4193_s2 = inlined_call_operand.hbm [shape: f32[1152,128], index: 2, kind: input, shape index: {}]   ;;  %s4194_s3 = inlined_call_operand.vmem [shape: f32[128,128], index: 3, kind: input, shape index: {}]   ;;  %s4195_s4 = inlined_call_operand.vmem [shape: f32[1,128], index: 4, kind: input, shape index: {}]   ;;  %s4196_s5 = inlined_call_operand.vmem [shape: f32[1,128], index: 5, kind: input, shape index: {}]   ;;  %s4197_s6 = inlined_call_operand.vmem [shape: f32[1,128], index: 6, kind: input, shape index: {}]   ;;  %s4198_s7 = inlined_call_operand.hbm [shape: f32[2,64,128], index: 7, kind: output, shape index: {}]  }
   0x1   :  { %13 = vsyncpa [#allocation5], 0 }
   0x2   :  { %15 = vsyncpa [#allocation5 + $0x1], 0  ;;  %s3036_s24 = smov 0   ;;  %s3038_s25 = smov 0  }
   0x3   :  { %s3040_s26 = smov 0   ;;  %s3042_s27 = smov 0  }
   0x4 LB: > { %s3057_s28 = sadd.s32 4294967295, %s2987_s27   ;;  %s2076_s29 = sadd.s32 4294967294, %s2987_s27   ;;  %s2987_s27 = sphi %s3042_s27, %s4227_s27   ;;  %s2983_s26 = sphi %s3040_s26, %s4226_s26   ;;  %s2979_s25 = sphi %s3038_s25, %s4225_s25   ;;  %s2975_s24 = sphi %s3036_s24, %s4224_s24  }
   0x5   : > { %s3061_s30 = sadd.s32 1, %s2987_s27   ;;  %s180_s8 = sadd.s32 1, %s2983_s26 }
   0x6   : > { %s177_s9 = ssub.s32 %s2987_s27, %s3061_s30  ;;  %p190_p0 = scmp.ne.s32.totalorder %s2983_s26, %s2979_s25 }
   0x7   : > { %p178_p1 = scmp.eq.s32.totalorder %s177_s9, 0  ;;  %p191_p2 = scmp.eq.s32.totalorder %s3057_s28, 1 }
   0x8   : > { %p196_p3 = scmp.ne.s32.totalorder %s2979_s25, %s2975_s24  ;;  %p197_p4 = scmp.eq.s32.totalorder %s2076_s29, 1 }
   0x9   : > { %s3072_s10 = scalar_select %p178_p1, %s2983_s26, %s180_s8  }
   0xa   : > { %p3074_p5 = por %p191_p2, %p190_p0  ;;  %p3078_p6 = por %p197_p4, %p196_p3 }
   0xb   : > { %p2077_p7 = scmp.ge.s32.totalorder %s2987_s27, 1  ;;  %p204_p8 = scmp.lt.s32.totalorder %s2987_s27, 3 }
   0xc   : > { %s4201_s12 = scalar_select %p3078_p6, 1, 0 }
   0xd   : > { %p2848_p9 = scmp.eq.s32.totalorder %s3057_s28, 0  ;;  %p3085_p10 = pnand %p2077_p7, %p204_p8 }
   0xe   : > { %s2989_s14 = smov [#allocation3]  }
   0xf   : > { %s219_s15 = sshll.u32 %s2989_s14, 4  ;;  %p2840_p11 = pneg %p3085_p10  ;;  %s220_s15 = int_to_ptr.vmem [resolvable:$true] %s219_s15 }
  0x10   : > { %s2908_s16 = scalar_lea.vmem %s220_s15, 18432  ;;  %p2916_p3 = scmp.lt.s32.totalorder %s220_s15, %s220_s15 }
  0x11   : > { %p2841_p12 = pnand %p2848_p9, %p2840_p11  ;;  %p2909_p0 = scmp.ne.s32.totalorder %s220_s15, %s2908_s16 }
  0x12   : > { %p2917_p4 = scmp.lt.s32.totalorder %s2908_s16, %s2908_s16 }
  0x13   : > { %p2899_p13 = pneg %p2841_p12 }
  0x14   : > { %p2918_p6 = por %p2917_p4, %p2916_p3 }
  0x15   : > { %p2911_p1 = pnand %p2909_p0, %p2899_p13 }
  0x17   : > { %p2912_p2 = pneg %p2911_p1 }
  0x19   : > { %p2919_p7 = pnand %p2918_p6, %p2912_p2 }
  0x1b   : > { %2922 = shalt.err (!%p2919_p7)
}
  0x1c   : > { %s2990_s17 = smov 128   ;;  %s2991_s18 = smov 8  }
  0x1d   : > { %2843 = dma.hbm_to_vmem [thread:$0]  (!%p2841_p12), %s4193_s2, 18432, %s220_s15, [#allocation4], %s2990_s17, %s2990_s17, %s2991_s18  }
  0x1e   : > { %255 = sbr.rel (%p3085_p10) target bundleno = 688 (0x2b0), region = 48 }
  0x23   : > { %2966 = dma.done.wait (%p2848_p9), [#allocation4], 18432  }
  0x24   : > { %2968 = vsyncadd (%p2848_p9), [#allocation4], 4294948864  ;;  %v400_v0 = vld [vmem:[%s4192_s1 + $0xf8] sm:$0xff]  ;;  %v399_v2 = vld [vmem:[%s4192_s1 + $0xf0] sm:$0xff]  ;;  %p287_p6 = scmp.lt.s32.totalorder %s3057_s28, 1  ;;  %s284_s17 = sand.u32 1, %s2979_s25  }
  0x25   : > { %v384_v1 = vld [vmem:[%s4192_s1 + $0x78] sm:$0xff]  ;;  %2149 = vmatprep.subr.mxu0 %v400_v0  ;;  %v383_v4 = vld [vmem:[%s4192_s1 + $0x70] sm:$0xff]  ;;  %v398_v6 = vld [vmem:[%s4192_s1 + $0xe8] sm:$0xff]  ;;  %s2082_s20 = sshll.u32 %s284_s17, 6  ;;  %s2148_s23 = sshll.u32 %s3057_s28, 10 }
  0x26   : > { %v432_v3 = vld [vmem:[%s4192_s1 + $0x1f8] sm:$0xff]  ;;  %2150 = vmatpush3.msra.mxu0 %v384_v1  ;;  %v431_v7 = vld [vmem:[%s4192_s1 + $0x1f0] sm:$0xff]  ;;  %v382_v8 = vld [vmem:[%s4192_s1 + $0x68] sm:$0xff]  ;;  %s3223_s15 = scalar_select %p287_p6, %s3057_s28, 1 }
  0x27   : > { %v416_v5 = vld [vmem:[%s4192_s1 + $0x178] sm:$0xff]  ;;  %2205 = vmatprep.subr.mxu1 %v432_v3  ;;  %2151 = vmatprep.subr.mxu0 %v399_v2  ;;  %v415_v9 = vld [vmem:[%s4192_s1 + $0x170] sm:$0xff]  ;;  %v430_v10 = vld [vmem:[%s4192_s1 + $0x1e8] sm:$0xff]  ;;  %s4097_s21 = scalar_lea.vmem [#allocation6], %s2082_s20  ;;  %s4145_s13 = scalar_lea.hbm %s4198_s7, %s2148_s23 }
  0x28   : > { %2206 = vmatpush3.msra.mxu1 %v416_v5  ;;  %2152 = vmatpush3.msra.mxu0 %v383_v4  ;;  %v397_v11 = vld [vmem:[%s4192_s1 + $0xe0] sm:$0xff]  ;;  %v414_v12 = vld [vmem:[%s4192_s1 + $0x168] sm:$0xff]  ;;  %v396_v15 = vld [vmem:[%s4192_s1 + $0xd8] sm:$0xff]  ;;  %s2833_s19 = smul.u32 576, %s3223_s15  ;;  %s2002_s22 = sshll.u32 %s4097_s21, 4  ;;  %s4140_s22 = int_to_ptr.vmem [resolvable:$true] %s2002_s22 }
  0x29   : > { %2207 = vmatprep.subr.mxu1 %v431_v7  ;;  %2153 = vmatprep.subr.mxu0 %v398_v6  ;;  %v381_v13 = vld [vmem:[%s4192_s1 + $0x60] sm:$0xff]  ;;  %v380_v17 = vld [vmem:[%s4192_s1 + $0x58] sm:$0xff]  ;;  %v395_v19 = vld [vmem:[%s4192_s1 + $0xd0] sm:$0xff]  ;;  %s4151_s15 = scalar_lea.sflag [#allocation5], %s284_s17  ;;  %s2923_s28 = scalar_lea.vmem %s4140_s22, 1024 }
  0x2a   : > { %2208 = vmatpush3.msra.mxu1 %v415_v9  ;;  %v429_v14 = vld [vmem:[%s4192_s1 + $0x1e0] sm:$0xff]  ;;  %2154 = vmatpush3.msra.mxu0 %v382_v8  ;;  %v428_v18 = vld [vmem:[%s4192_s1 + $0x1d8] sm:$0xff]  ;;  %v379_v21 = vld [vmem:[%s4192_s1 + $0x50] sm:$0xff]  ;;  %s3277_s8 = scalar_lea.vmem %s4191_s0, %s2833_s19  ;;  %p2924_p8 = scmp.ne.s32.totalorder %s4140_s22, %s2923_s28 }
  0x2b   : > { %2209 = vmatprep.subr.mxu1 %v430_v10  ;;  %v413_v16 = vld [vmem:[%s4192_s1 + $0x160] sm:$0xff]  ;;  %2155 = vmatprep.subr.mxu0 %v397_v11  ;;  %v412_v20 = vld [vmem:[%s4192_s1 + $0x158] sm:$0xff]  ;;  %v427_v22 = vld [vmem:[%s4192_s1 + $0x1d0] sm:$0xff]  ;;  %s2993_s14 = smov [#allocation6]  }
  0x2c   : > { %2210 = vmatpush3.msra.mxu1 %v414_v12  ;;  %2156 = vmatpush3.msra.mxu0 %v381_v13  ;;  %v394_v23 = vld [vmem:[%s4192_s1 + $0xc8] sm:$0xff]  ;;  %v411_v24 = vld [vmem:[%s4192_s1 + $0x150] sm:$0xff]  ;;  %v393_v27 = vld [vmem:[%s4192_s1 + $0xc0] sm:$0xff]  ;;  %p2925_p9 = pnand %p2924_p8, %p3074_p5 }
  0x2d   : > { %2211 = vmatprep.subr.mxu1 %v429_v14  ;;  %2157 = vmatprep.subr.mxu0 %v396_v15  ;;  %v378_v25 = vld [vmem:[%s4192_s1 + $0x48] sm:$0xff]  ;;  %v377_v29 = vld [vmem:[%s4192_s1 + $0x40] sm:$0xff]  ;;  %v392_v31 = vld [vmem:[%s4192_s1 + $0xb8] sm:$0xff] }
  0x2e   : > { %2212 = vmatpush3.msra.mxu1 %v413_v16  ;;  %2158 = vmatpush3.msra.mxu0 %v380_v17  ;;  %v426_v26 = vld [vmem:[%s4192_s1 + $0x1c8] sm:$0xff]  ;;  %v425_v30 = vld [vmem:[%s4192_s1 + $0x1c0] sm:$0xff]  ;;  %v376_v33 = vld [vmem:[%s4192_s1 + $0x38] sm:$0xff]  ;;  %p2926_p10 = pneg %p2925_p9 }
  0x2f   : > { %2213 = vmatprep.subr.mxu1 %v428_v18  ;;  %2159 = vmatprep.subr.mxu0 %v395_v19  ;;  %v410_v28 = vld [vmem:[%s4192_s1 + $0x148] sm:$0xff]  ;;  %v409_v32 = vld [vmem:[%s4192_s1 + $0x140] sm:$0xff]  ;;  %v424_v34 = vld [vmem:[%s4192_s1 + $0x1b8] sm:$0xff] }
  0x30   : > { %2214 = vmatpush3.msra.mxu1 %v412_v20  ;;  %2160 = vmatpush3.msra.mxu0 %v379_v21  ;;  %v391_v35 = vld [vmem:[%s4192_s1 + $0xb0] sm:$0xff]  ;;  %v408_v36 = vld [vmem:[%s4192_s1 + $0x138] sm:$0xff]  ;;  %v390_v39 = vld [vmem:[%s4192_s1 + $0xa8] sm:$0xff] }
  0x31   : > { %2215 = vmatprep.subr.mxu1 %v427_v22  ;;  %2161 = vmatprep.subr.mxu0 %v394_v23  ;;  %v375_v37 = vld [vmem:[%s4192_s1 + $0x30] sm:$0xff]  ;;  %v374_v41 = vld [vmem:[%s4192_s1 + $0x28] sm:$0xff]  ;;  %v389_v43 = vld [vmem:[%s4192_s1 + $0xa0] sm:$0xff] }
  0x32   : > { %2216 = vmatpush3.msra.mxu1 %v411_v24  ;;  %2162 = vmatpush3.msra.mxu0 %v378_v25  ;;  %v423_v38 = vld [vmem:[%s4192_s1 + $0x1b0] sm:$0xff]  ;;  %v422_v42 = vld [vmem:[%s4192_s1 + $0x1a8] sm:$0xff]  ;;  %v373_v45 = vld [vmem:[%s4192_s1 + $0x20] sm:$0xff] }
  0x33   : > { %2217 = vmatprep.subr.mxu1 %v426_v26  ;;  %2163 = vmatprep.subr.mxu0 %v393_v27  ;;  %v407_v40 = vld [vmem:[%s4192_s1 + $0x130] sm:$0xff]  ;;  %v406_v44 = vld [vmem:[%s4192_s1 + $0x128] sm:$0xff]  ;;  %v421_v46 = vld [vmem:[%s4192_s1 + $0x1a0] sm:$0xff] }
  0x34   : > { %2218 = vmatpush3.msra.mxu1 %v410_v28  ;;  %2164 = vmatpush3.msra.mxu0 %v377_v29  ;;  %v388_v47 = vld [vmem:[%s4192_s1 + $0x98] sm:$0xff]  ;;  %v405_v48 = vld [vmem:[%s4192_s1 + $0x120] sm:$0xff]  ;;  %v387_v51 = vld [vmem:[%s4192_s1 + $0x90] sm:$0xff] }
  0x35   : > { %2219 = vmatprep.subr.mxu1 %v425_v30  ;;  %2165 = vmatprep.subr.mxu0 %v392_v31  ;;  %v372_v49 = vld [vmem:[%s4192_s1 + $0x18] sm:$0xff]  ;;  %v371_v53 = vld [vmem:[%s4192_s1 + $0x10] sm:$0xff]  ;;  %v386_v55 = vld [vmem:[%s4192_s1 + $0x88] sm:$0xff] }
  0x36   : > { %2220 = vmatpush3.msra.mxu1 %v409_v32  ;;  %2166 = vmatpush3.msra.mxu0 %v376_v33  ;;  %v420_v50 = vld [vmem:[%s4192_s1 + $0x198] sm:$0xff]  ;;  %v419_v54 = vld [vmem:[%s4192_s1 + $0x190] sm:$0xff]  ;;  %v370_v57 = vld [vmem:[%s4192_s1 + $0x8] sm:$0xff] }
  0x37   : > { %2221 = vmatprep.subr.mxu1 %v424_v34  ;;  %2167 = vmatprep.subr.mxu0 %v391_v35  ;;  %v404_v52 = vld [vmem:[%s4192_s1 + $0x118] sm:$0xff]  ;;  %v403_v56 = vld [vmem:[%s4192_s1 + $0x110] sm:$0xff]  ;;  %v418_v58 = vld [vmem:[%s4192_s1 + $0x188] sm:$0xff] }
  0x38   : > { %2222 = vmatpush3.msra.mxu1 %v408_v36  ;;  %2168 = vmatpush3.msra.mxu0 %v375_v37  ;;  %v385_v59 = vld [vmem:[%s4192_s1 + $0x80] sm:$0xff]  ;;  %v2084_v60 = vld [vmem:[%s3277_s8 + $0x90] sm:$0xff]  ;;  %v402_v62 = vld [vmem:[%s4192_s1 + $0x108] sm:$0xff] }
  0x39   : > { %2223 = vmatprep.subr.mxu1 %v423_v38  ;;  %2169 = vmatprep.subr.mxu0 %v390_v39  ;;  %v369_v61 = vld [vmem:[%s4192_s1] sm:$0xff]  ;;  %v464_v1 = vld [vmem:[%s4192_s1 + $0x2f8] sm:$0xff]  ;;  %v463_v6 = vld [vmem:[%s4192_s1 + $0x2f0] sm:$0xff] }
  0x3a   : > { %2224 = vmatpush3.msra.mxu1 %v407_v40  ;;  %2170 = vmatpush3.msra.mxu0 %v374_v41  ;;  %v292_v63 = vld [vmem:[%s3277_s8] sm:$0xff]  ;;  %v448_v4 = vld [vmem:[%s4192_s1 + $0x278] sm:$0xff]  ;;  %v447_v9 = vld [vmem:[%s4192_s1 + $0x270] sm:$0xff] }
  0x3b   : > { %2225 = vmatprep.subr.mxu1 %v422_v42  ;;  %2171 = vmatprep.subr.mxu0 %v389_v43  ;;  %v417_v0 = vld [vmem:[%s4192_s1 + $0x180] sm:$0xff]  ;;  %v496_v7 = vld [vmem:[%s4192_s1 + $0x3f8] sm:$0xff]  ;;  %v3332_v11 = vld [vmem:[%s3277_s8 + $0x10] sm:$0xff] }
  0x3c   : > { %2226 = vmatpush3.msra.mxu1 %v406_v44  ;;  %2172 = vmatpush3.msra.mxu0 %v373_v45  ;;  %v401_v2 = vld [vmem:[%s4192_s1 + $0x100] sm:$0xff]  ;;  %v480_v10 = vld [vmem:[%s4192_s1 + $0x378] sm:$0xff]  ;;  %v462_v12 = vld [vmem:[%s4192_s1 + $0x2e8] sm:$0xff] }
  0x3d   : > { %2227 = vmatprep.subr.mxu1 %v421_v46  ;;  %2173 = vmatprep.subr.mxu0 %v388_v47  ;;  %v2092_v3 = vld [vmem:[%s3277_s8 + $0x120] sm:$0xff]  ;;  %v495_v13 = vld [vmem:[%s4192_s1 + $0x3f0] sm:$0xff]  ;;  %v446_v15 = vld [vmem:[%s4192_s1 + $0x268] sm:$0xff] }
  0x3e   : > { %2228 = vmatpush3.msra.mxu1 %v405_v48  ;;  %2174 = vmatpush3.msra.mxu0 %v372_v49  ;;  %v309_v5 = vld [vmem:[%s3277_s8 + $0x1] sm:$0xff]  ;;  %v2093_v14 = vld [vmem:[%s3277_s8 + $0x130] sm:$0xff]  ;;  %v460_v24 = vld [vmem:[%s4192_s1 + $0x2d8] sm:$0xff] }
  0x3f   : > { %2229 = vmatprep.subr.mxu1 %v420_v50  ;;  %2175 = vmatprep.subr.mxu0 %v387_v51  ;;  %v3323_v8 = vld [vmem:[%s3277_s8 + $0xa0] sm:$0xff]  ;;  %v479_v16 = vld [vmem:[%s4192_s1 + $0x370] sm:$0xff]  ;;  %v494_v19 = vld [vmem:[%s4192_s1 + $0x3e8] sm:$0xff] }
  0x40   : > { %2230 = vmatpush3.msra.mxu1 %v404_v52  ;;  %2176 = vmatpush3.msra.mxu0 %v371_v53  ;;  %v3350_v17 = vld [vmem:[%s3277_s8 + $0x11] sm:$0xff]  ;;  %v461_v18 = vld [vmem:[%s4192_s1 + $0x2e0] sm:$0xff]  ;;  %v478_v22 = vld [vmem:[%s4192_s1 + $0x368] sm:$0xff] }
  0x41   : > { %2231 = vmatprep.subr.mxu1 %v419_v54  ;;  %2177 = vmatprep.subr.mxu0 %v386_v55  ;;  %v3359_v20 = vld [vmem:[%s3277_s8 + $0xb0] sm:$0xff]  ;;  %v445_v21 = vld [vmem:[%s4192_s1 + $0x260] sm:$0xff]  ;;  %v444_v27 = vld [vmem:[%s4192_s1 + $0x258] sm:$0xff] }
  0x42   : > { %2232 = vmatpush3.msra.mxu1 %v403_v56  ;;  %2178 = vmatpush3.msra.mxu0 %v370_v57  ;;  %v3369_v23 = vld [vmem:[%s3277_s8 + $0x20] sm:$0xff]  ;;  %v459_v30 = vld [vmem:[%s4192_s1 + $0x2d0] sm:$0xff]  ;;  %v492_v31 = vld [vmem:[%s4192_s1 + $0x3d8] sm:$0xff] }
  0x43   : > { %2233 = vmatprep.subr.mxu1 %v418_v58  ;;  %2179 = vmatprep.subr.mxu0 %v385_v59  ;;  %v493_v25 = vld [vmem:[%s4192_s1 + $0x3e0] sm:$0xff]  ;;  %v443_v33 = vld [vmem:[%s4192_s1 + $0x250] sm:$0xff]  ;;  %v476_v34 = vld [vmem:[%s4192_s1 + $0x358] sm:$0xff] }
  0x44   : > { %584 = vmatprep.mubr.f32.mxu0 %v2084_v60  ;;  %2180 = vmatpush3.msra.mxu0 %v369_v61  ;;  %v2094_v26 = vld [vmem:[%s3277_s8 + $0x140] sm:$0xff]  ;;  %v3406_v35 = vld [vmem:[%s3277_s8 + $0x30] sm:$0xff]  ;;  %v458_v36 = vld [vmem:[%s4192_s1 + $0x2c8] sm:$0xff] }
  0x45   : > { %2234 = vmatpush3.msra.mxu1 %v402_v62  ;;  %585 = vmatmul.mubr.f32.vlgmr.msra.gmra.mxu0 %v292_v63  ;;  %v477_v28 = vld [vmem:[%s4192_s1 + $0x360] sm:$0xff]  ;;  %v491_v37 = vld [vmem:[%s4192_s1 + $0x3d0] sm:$0xff]  ;;  %v442_v39 = vld [vmem:[%s4192_s1 + $0x248] sm:$0xff] }
  0x46   : > { %2235 = vmatprep.subr.mxu1 %v417_v0  ;;  %2261 = vmatprep.subr.mxu0 %v464_v1  ;;  %v3387_v29 = vld [vmem:[%s3277_s8 + $0x21] sm:$0xff]  ;;  %v2095_v38 = vld [vmem:[%s3277_s8 + $0x150] sm:$0xff]  ;;  %v456_v48 = vld [vmem:[%s4192_s1 + $0x2b8] sm:$0xff] }
  0x47   : > { %2236 = vmatpush3.msra.mxu1 %v401_v2  ;;  %689 = vmatprep.mubr.f32.mxu1 %v2092_v3  ;;  %v3396_v32 = vld [vmem:[%s3277_s8 + $0xc0] sm:$0xff]  ;;  %v475_v40 = vld [vmem:[%s4192_s1 + $0x350] sm:$0xff]  ;;  %v490_v43 = vld [vmem:[%s4192_s1 + $0x3c8] sm:$0xff] }
  0x48   : > { %2262 = vmatpush3.msra.mxu0 %v448_v4  ;;  %690 = vmatmul.mubr.f32.vlgmr.msra.gmra.mxu1 %v309_v5  ;;  %v3424_v41 = vld [vmem:[%s3277_s8 + $0x31] sm:$0xff]  ;;  %v457_v42 = vld [vmem:[%s4192_s1 + $0x2c0] sm:$0xff]  ;;  %v474_v46 = vld [vmem:[%s4192_s1 + $0x348] sm:$0xff] }
  0x49   : > { %2263 = vmatprep.subr.mxu0 %v463_v6  ;;  %2317 = vmatprep.subr.mxu1 %v496_v7  ;;  %v3433_v44 = vld [vmem:[%s3277_s8 + $0xd0] sm:$0xff]  ;;  %v441_v45 = vld [vmem:[%s4192_s1 + $0x240] sm:$0xff]  ;;  %v440_v51 = vld [vmem:[%s4192_s1 + $0x238] sm:$0xff] }
  0x4a   : > { %589 = vmatprep.mubr.f32.mxu0 %v3323_v8  ;;  %2264 = vmatpush3.msra.mxu0 %v447_v9  ;;  %v3443_v47 = vld [vmem:[%s3277_s8 + $0x40] sm:$0xff]  ;;  %v455_v54 = vld [vmem:[%s4192_s1 + $0x2b0] sm:$0xff]  ;;  %v488_v55 = vld [vmem:[%s4192_s1 + $0x3b8] sm:$0xff] }
  0x4b   : > { %2318 = vmatpush3.msra.mxu1 %v480_v10  ;;  %590 = vmatmul.mubr.f32.gmra.mxu0 %v3332_v11  ;;  %v489_v49 = vld [vmem:[%s4192_s1 + $0x3c0] sm:$0xff]  ;;  %v439_v57 = vld [vmem:[%s4192_s1 + $0x230] sm:$0xff]  ;;  %v472_v58 = vld [vmem:[%s4192_s1 + $0x338] sm:$0xff] }
  0x4c   : > { %2265 = vmatprep.subr.mxu0 %v462_v12  ;;  %2319 = vmatprep.subr.mxu1 %v495_v13  ;;  %v2096_v50 = vld [vmem:[%s3277_s8 + $0x160] sm:$0xff]  ;;  %v3480_v59 = vld [vmem:[%s3277_s8 + $0x50] sm:$0xff]  ;;  %v454_v60 = vld [vmem:[%s4192_s1 + $0x2a8] sm:$0xff] }
  0x4d   : > { %694 = vmatprep.mubr.f32.mxu1 %v2093_v14  ;;  %2266 = vmatpush3.msra.mxu0 %v446_v15  ;;  %v473_v52 = vld [vmem:[%s4192_s1 + $0x340] sm:$0xff]  ;;  %v487_v61 = vld [vmem:[%s4192_s1 + $0x3b0] sm:$0xff]  ;;  %v438_v63 = vld [vmem:[%s4192_s1 + $0x228] sm:$0xff] }
  0x4e   : > { %2320 = vmatpush3.msra.mxu1 %v479_v16  ;;  %2267 = vmatprep.subr.mxu0 %v461_v18  ;;  %v3461_v53 = vld [vmem:[%s3277_s8 + $0x41] sm:$0xff]  ;;  %v2097_v62 = vld [vmem:[%s3277_s8 + $0x170] sm:$0xff]  ;;  %v452_v9 = vld [vmem:[%s4192_s1 + $0x298] sm:$0xff] }
  0x4f   : > { %695 = vmatmul.mubr.f32.gmra.mxu1 %v3350_v17  ;;  %2321 = vmatprep.subr.mxu1 %v494_v19  ;;  %v3470_v56 = vld [vmem:[%s3277_s8 + $0xe0] sm:$0xff]  ;;  %v471_v0 = vld [vmem:[%s4192_s1 + $0x330] sm:$0xff]  ;;  %v486_v3 = vld [vmem:[%s4192_s1 + $0x3a8] sm:$0xff] }
  0x50   : > { %594 = vmatprep.mubr.f32.mxu0 %v3359_v20  ;;  %2268 = vmatpush3.msra.mxu0 %v445_v21  ;;  %v3498_v1 = vld [vmem:[%s3277_s8 + $0x51] sm:$0xff]  ;;  %v453_v2 = vld [vmem:[%s4192_s1 + $0x2a0] sm:$0xff]  ;;  %v470_v6 = vld [vmem:[%s4192_s1 + $0x328] sm:$0xff] }
  0x51   : > { %2322 = vmatpush3.msra.mxu1 %v478_v22  ;;  %595 = vmatmul.mubr.f32.gmra.mxu0 %v3369_v23  ;;  %v3507_v4 = vld [vmem:[%s3277_s8 + $0xf0] sm:$0xff]  ;;  %v437_v5 = vld [vmem:[%s4192_s1 + $0x220] sm:$0xff]  ;;  %v436_v13 = vld [vmem:[%s4192_s1 + $0x218] sm:$0xff] }
  0x52   : > { %2269 = vmatprep.subr.mxu0 %v460_v24  ;;  %2323 = vmatprep.subr.mxu1 %v493_v25  ;;  %v3517_v7 = vld [vmem:[%s3277_s8 + $0x60] sm:$0xff]  ;;  %v451_v16 = vld [vmem:[%s4192_s1 + $0x290] sm:$0xff]  ;;  %v484_v18 = vld [vmem:[%s4192_s1 + $0x398] sm:$0xff] }
  0x53   : > { %699 = vmatprep.mubr.f32.mxu1 %v2094_v26  ;;  %2270 = vmatpush3.msra.mxu0 %v444_v27  ;;  %v485_v10 = vld [vmem:[%s4192_s1 + $0x3a0] sm:$0xff]  ;;  %v435_v21 = vld [vmem:[%s4192_s1 + $0x210] sm:$0xff]  ;;  %v468_v22 = vld [vmem:[%s4192_s1 + $0x318] sm:$0xff] }
  0x54   : > { %2324 = vmatpush3.msra.mxu1 %v477_v28  ;;  %2271 = vmatprep.subr.mxu0 %v459_v30  ;;  %v2098_v12 = vld [vmem:[%s3277_s8 + $0x180] sm:$0xff]  ;;  %v3554_v24 = vld [vmem:[%s3277_s8 + $0x70] sm:$0xff]  ;;  %v450_v25 = vld [vmem:[%s4192_s1 + $0x288] sm:$0xff] }
  0x55   : > { %700 = vmatmul.mubr.f32.gmra.mxu1 %v3387_v29  ;;  %2325 = vmatprep.subr.mxu1 %v492_v31  ;;  %v469_v14 = vld [vmem:[%s4192_s1 + $0x320] sm:$0xff]  ;;  %v483_v26 = vld [vmem:[%s4192_s1 + $0x390] sm:$0xff]  ;;  %v434_v28 = vld [vmem:[%s4192_s1 + $0x208] sm:$0xff] }
  0x56   : > { %599 = vmatprep.mubr.f32.mxu0 %v3396_v32  ;;  %2272 = vmatpush3.msra.mxu0 %v443_v33  ;;  %v3535_v15 = vld [vmem:[%s3277_s8 + $0x61] sm:$0xff]  ;;  %v2099_v27 = vld [vmem:[%s3277_s8 + $0x190] sm:$0xff] }
  0x57   : > { %2326 = vmatpush3.msra.mxu1 %v476_v34  ;;  %600 = vmatmul.mubr.f32.gmra.mxu0 %v3406_v35  ;;  %v3544_v19 = vld [vmem:[%s3277_s8 + $0x100] sm:$0xff]  ;;  %v467_v30 = vld [vmem:[%s4192_s1 + $0x310] sm:$0xff]  ;;  %v482_v34 = vld [vmem:[%s4192_s1 + $0x388] sm:$0xff] }
  0x58   : > { %2273 = vmatprep.subr.mxu0 %v458_v36  ;;  %2327 = vmatprep.subr.mxu1 %v491_v37  ;;  %v3572_v31 = vld [vmem:[%s3277_s8 + $0x71] sm:$0xff]  ;;  %v449_v33 = vld [vmem:[%s4192_s1 + $0x280] sm:$0xff] }
  0x59   : > { %704 = vmatprep.mubr.f32.mxu1 %v2095_v38  ;;  %2274 = vmatpush3.msra.mxu0 %v442_v39  ;;  %v433_v36 = vld [vmem:[%s4192_s1 + $0x200] sm:$0xff]  ;;  %v466_v38 = vld [vmem:[%s4192_s1 + $0x308] sm:$0xff]  ;;  %v2100_v39 = vld [vmem:[%s3277_s8 + $0x1b0] sm:$0xff] }
  0x5a   : > { %2328 = vmatpush3.msra.mxu1 %v475_v40  ;;  %2275 = vmatprep.subr.mxu0 %v457_v42  ;;  %v2108_v37 = vld [vmem:[%s3277_s8 + $0x121] sm:$0xff]  ;;  %v512_v42 = vld [vmem:[%s4192_s1 + $0x478] sm:$0xff] }
  0x5b   : > { %705 = vmatmul.mubr.f32.gmra.mxu1 %v3424_v41  ;;  %2329 = vmatprep.subr.mxu1 %v490_v43  ;;  %v481_v40 = vld [vmem:[%s4192_s1 + $0x380] sm:$0xff] }
  0x5c   : > { %604 = vmatprep.mubr.f32.mxu0 %v3433_v44  ;;  %2276 = vmatpush3.msra.mxu0 %v441_v45  ;;  %v465_v43 = vld [vmem:[%s4192_s1 + $0x300] sm:$0xff]  ;;  %v511_v45 = vld [vmem:[%s4192_s1 + $0x470] sm:$0xff] }
  0x5d   : > { %2330 = vmatpush3.msra.mxu1 %v474_v46  ;;  %605 = vmatmul.mubr.f32.gmra.mxu0 %v3443_v47  ;;  %v2109_v46 = vld [vmem:[%s3277_s8 + $0x131] sm:$0xff] }
  0x5e   : > { %2277 = vmatprep.subr.mxu0 %v456_v48  ;;  %2331 = vmatprep.subr.mxu1 %v489_v49  ;;  %v2101_v48 = vld [vmem:[%s3277_s8 + $0x1c0] sm:$0xff]  ;;  %v510_v49 = vld [vmem:[%s4192_s1 + $0x468] sm:$0xff] }
  0x5f   : > { %709 = vmatprep.mubr.f32.mxu1 %v2096_v50  ;;  %2278 = vmatpush3.msra.mxu0 %v440_v51  ;;  %v509_v50 = vld [vmem:[%s4192_s1 + $0x460] sm:$0xff]  ;;  %v2102_v51 = vld [vmem:[%s3277_s8 + $0x1d0] sm:$0xff] }
  0x60   : > { %2332 = vmatpush3.msra.mxu1 %v473_v52  ;;  %2279 = vmatprep.subr.mxu0 %v455_v54  ;;  %v507_v52 = vld [vmem:[%s4192_s1 + $0x450] sm:$0xff]  ;;  %v2103_v54 = vld [vmem:[%s3277_s8 + $0x1e0] sm:$0xff] }
  0x61   : > { %710 = vmatmul.mubr.f32.gmra.mxu1 %v3461_v53  ;;  %2333 = vmatprep.subr.mxu1 %v488_v55  ;;  %v505_v55 = vld [vmem:[%s4192_s1 + $0x440] sm:$0xff] }
  0x62   : > { %609 = vmatprep.mubr.f32.mxu0 %v3470_v56  ;;  %2280 = vmatpush3.msra.mxu0 %v439_v57  ;;  %v2104_v57 = vld [vmem:[%s3277_s8 + $0x1f0] sm:$0xff] }
  0x63   : > { %2334 = vmatpush3.msra.mxu1 %v472_v58  ;;  %610 = vmatmul.mubr.f32.gmra.mxu0 %v3480_v59  ;;  %v503_v58 = vld [vmem:[%s4192_s1 + $0x430] sm:$0xff] }
  0x64   : > { %2281 = vmatprep.subr.mxu0 %v454_v60  ;;  %2335 = vmatprep.subr.mxu1 %v487_v61  ;;  %v2105_v60 = vld [vmem:[%s3277_s8 + $0x200] sm:$0xff] }
  0x65   : > { %714 = vmatprep.mubr.f32.mxu1 %v2097_v62  ;;  %2282 = vmatpush3.msra.mxu0 %v438_v63  ;;  %v501_v61 = vld [vmem:[%s4192_s1 + $0x420] sm:$0xff]  ;;  %v2106_v62 = vld [vmem:[%s3277_s8 + $0x210] sm:$0xff] }
  0x66   : > { %2336 = vmatpush3.msra.mxu1 %v471_v0  ;;  %2283 = vmatprep.subr.mxu0 %v453_v2  ;;  %v499_v63 = vld [vmem:[%s4192_s1 + $0x410] sm:$0xff]  ;;  %v2107_v2 = vld [vmem:[%s3277_s8 + $0x220] sm:$0xff] }
  0x67   : > { %715 = vmatmul.mubr.f32.gmra.mxu1 %v3498_v1  ;;  %2337 = vmatprep.subr.mxu1 %v486_v3  ;;  %v2115_v0 = vld [vmem:[%s3277_s8 + $0x191] sm:$0xff]  ;;  %v498_v3 = vld [vmem:[%s4192_s1 + $0x408] sm:$0xff] }
  0x68   : > { %614 = vmatprep.mubr.f32.mxu0 %v3507_v4  ;;  %2284 = vmatpush3.msra.mxu0 %v437_v5  ;;  %v2123_v5 = vld [vmem:[%s3277_s8 + $0x80] sm:$0xff] }
  0x69   : > { %2338 = vmatpush3.msra.mxu1 %v470_v6  ;;  %615 = vmatmul.mubr.f32.gmra.mxu0 %v3517_v7  ;;  %v497_v6 = vld [vmem:[%s4192_s1 + $0x400] sm:$0xff] }
  0x6a   : > { %2285 = vmatprep.subr.mxu0 %v452_v9  ;;  %2339 = vmatprep.subr.mxu1 %v485_v10  ;;  %v1191_v9 = vld [vmem:[#allocation3 + $0xf8] sm:$0xff] }
  0x6b   : > { %719 = vmatprep.mubr.f32.mxu1 %v2098_v12  ;;  %2286 = vmatpush3.msra.mxu0 %v436_v13  ;;  %v1175_v10 = vld [vmem:[#allocation3 + $0x78] sm:$0xff]  ;;  %v1190_v12 = vld [vmem:[#allocation3 + $0xf0] sm:$0xff] }
  0x6c   : > { %2340 = vmatpush3.msra.mxu1 %v469_v14  ;;  %2287 = vmatprep.subr.mxu0 %v451_v16  ;;  %v1187_v13 = vld [vmem:[#allocation3 + $0xd8] sm:$0xff]  ;;  %v1186_v16 = vld [vmem:[#allocation3 + $0xd0] sm:$0xff] }
  0x6d   : > { %720 = vmatmul.mubr.f32.gmra.mxu1 %v3535_v15  ;;  %2341 = vmatprep.subr.mxu1 %v484_v18  ;;  %v1171_v14 = vld [vmem:[#allocation3 + $0x58] sm:$0xff] }
  0x6e   : > { %619 = vmatprep.mubr.f32.mxu0 %v3544_v19  ;;  %2288 = vmatpush3.msra.mxu0 %v435_v21  ;;  %v1207_v18 = vld [vmem:[#allocation3 + $0x178] sm:$0xff]  ;;  %v1222_v21 = vld [vmem:[#allocation3 + $0x1f0] sm:$0xff] }
  0x6f   : > { %2342 = vmatpush3.msra.mxu1 %v468_v22  ;;  %620 = vmatmul.mubr.f32.gmra.mxu0 %v3554_v24  ;;  %v1185_v22 = vld [vmem:[#allocation3 + $0xc8] sm:$0xff] }
  0x70   : > { %2289 = vmatprep.subr.mxu0 %v450_v25  ;;  %2343 = vmatprep.subr.mxu1 %v483_v26  ;;  %v1169_v25 = vld [vmem:[#allocation3 + $0x48] sm:$0xff] }
  0x71   : > { %724 = vmatprep.mubr.f32.mxu1 %v2099_v27  ;;  %2290 = vmatpush3.msra.mxu0 %v434_v28  ;;  %v1221_v26 = vld [vmem:[#allocation3 + $0x1e8] sm:$0xff]  ;;  %v1184_v27 = vld [vmem:[#allocation3 + $0xc0] sm:$0xff] }
  0x72   : > { %2344 = vmatpush3.msra.mxu1 %v467_v30  ;;  %2291 = vmatprep.subr.mxu0 %v449_v33  ;;  %v1205_v28 = vld [vmem:[#allocation3 + $0x168] sm:$0xff]  ;;  %v1168_v30 = vld [vmem:[#allocation3 + $0x40] sm:$0xff]  ;;  %v1183_v33 = vld [vmem:[#allocation3 + $0xb8] sm:$0xff] }
  0x73   : > { %725 = vmatmul.mubr.f32.gmra.mxu1 %v3572_v31  ;;  %2345 = vmatprep.subr.mxu1 %v482_v34  ;;  %v1204_v34 = vld [vmem:[#allocation3 + $0x160] sm:$0xff] }
  0x74   : > { %2292 = vmatpush3.msra.mxu0 %v433_v36  ;;  %794 = vmatprep.mubr.f32.mxu0 %v2108_v37  ;;  %v1167_v36 = vld [vmem:[#allocation3 + $0x38] sm:$0xff] }
  0x75   : > { %2346 = vmatpush3.msra.mxu1 %v466_v38  ;;  %795 = vmatmul.mubr.f32.vlgmr.msra.gmra.mxu0 %v2100_v39  ;;  %v1219_v37 = vld [vmem:[#allocation3 + $0x1d8] sm:$0xff]  ;;  %v1182_v38 = vld [vmem:[#allocation3 + $0xb0] sm:$0xff] }
  0x76   : > { %2347 = vmatprep.subr.mxu1 %v481_v40  ;;  %2669 = vmatprep.subr.mxu0 %v512_v42  ;;  %v1203_v39 = vld [vmem:[#allocation3 + $0x158] sm:$0xff]  ;;  %v1166_v40 = vld [vmem:[#allocation3 + $0x30] sm:$0xff] }
  0x77   : > { %2348 = vmatpush3.msra.mxu1 %v465_v43  ;;  %899 = vmatprep.mubr.f32.mxu1 %v3323_v8  ;;  %v2110_v8 = vld [vmem:[%s3277_s8 + $0x141] sm:$0xff] }
  0x78   : > { %2670 = vmatpush3.msra.mxu0 %v512_v42  ;;  %900 = vmatmul.mubr.f32.vlgmr.msra.gmra.mxu1 %v3332_v11  ;;  %v508_v11 = vld [vmem:[%s4192_s1 + $0x458] sm:$0xff]  ;;  %v1218_v42 = vld [vmem:[#allocation3 + $0x1d0] sm:$0xff]  ;;  %v1181_v43 = vld [vmem:[#allocation3 + $0xa8] sm:$0xff] }
  0x79   : > { %2671 = vmatprep.subr.mxu0 %v511_v45  ;;  %799 = vmatprep.mubr.f32.mxu0 %v2109_v46  ;;  %v1165_v46 = vld [vmem:[#allocation3 + $0x28] sm:$0xff] }
  0x7a   : > { %2672 = vmatpush3.msra.mxu0 %v511_v45  ;;  %904 = vmatprep.mubr.f32.mxu1 %v3359_v20  ;;  %v2111_v20 = vld [vmem:[%s3277_s8 + $0x151] sm:$0xff] }
  0x7b   : > { %800 = vmatmul.mubr.f32.gmra.mxu0 %v2101_v48  ;;  %2673 = vmatprep.subr.mxu0 %v510_v49  ;;  %v1202_v45 = vld [vmem:[#allocation3 + $0x150] sm:$0xff]  ;;  %v1217_v48 = vld [vmem:[#allocation3 + $0x1c8] sm:$0xff] }
  0x7c   : > { %2674 = vmatpush3.msra.mxu0 %v510_v49  ;;  %905 = vmatmul.mubr.f32.gmra.mxu1 %v3369_v23  ;;  %v506_v23 = vld [vmem:[%s4192_s1 + $0x448] sm:$0xff]  ;;  %v1180_v49 = vld [vmem:[#allocation3 + $0xa0] sm:$0xff] }
  0x7d   : > { %2675 = vmatprep.subr.mxu0 %v509_v50  ;;  %804 = vmatprep.mubr.f32.mxu0 %v2110_v8  ;;  %v1164_v8 = vld [vmem:[#allocation3 + $0x20] sm:$0xff] }
  0x7e   : > { %2676 = vmatpush3.msra.mxu0 %v509_v50  ;;  %909 = vmatprep.mubr.f32.mxu1 %v3396_v32  ;;  %v2112_v32 = vld [vmem:[%s3277_s8 + $0x161] sm:$0xff] }
  0x7f   : > { %805 = vmatmul.mubr.f32.gmra.mxu0 %v2102_v51  ;;  %2677 = vmatprep.subr.mxu0 %v508_v11  ;;  %v1201_v50 = vld [vmem:[#allocation3 + $0x148] sm:$0xff]  ;;  %v1216_v51 = vld [vmem:[#allocation3 + $0x1c0] sm:$0xff] }
  0x80   : > { %2678 = vmatpush3.msra.mxu0 %v508_v11  ;;  %910 = vmatmul.mubr.f32.gmra.mxu1 %v3406_v35  ;;  %v504_v35 = vld [vmem:[%s4192_s1 + $0x438] sm:$0xff] }
  0x81   : > { %2679 = vmatprep.subr.mxu0 %v507_v52  ;;  %809 = vmatprep.mubr.f32.mxu0 %v2111_v20  ;;  %v1179_v11 = vld [vmem:[#allocation3 + $0x98] sm:$0xff]  ;;  %v1200_v20 = vld [vmem:[#allocation3 + $0x140] sm:$0xff] }
  0x82   : > { %2680 = vmatpush3.msra.mxu0 %v507_v52  ;;  %914 = vmatprep.mubr.f32.mxu1 %v3433_v44  ;;  %v2113_v44 = vld [vmem:[%s3277_s8 + $0x171] sm:$0xff]  ;;  %v2992_v52 = vmov 0.0  }
  0x83   : > { %810 = vmatmul.mubr.f32.gmra.mxu0 %v2103_v54  ;;  %2681 = vmatprep.subr.mxu0 %v506_v23  ;;  %1053 = vst [vmem:[#allocation2] sm:$0xff] %v2992_v52  ;;  %1054 = vst [vmem:[#allocation2 + $0x8] sm:$0x3] %v2992_v52  ;;  %v1163_v54 = vld [vmem:[#allocation3 + $0x18] sm:$0xff] }
  0x84   : > { %2682 = vmatpush3.msra.mxu0 %v506_v23  ;;  %915 = vmatmul.mubr.f32.gmra.mxu1 %v3443_v47  ;;  %v502_v47 = vld [vmem:[%s4192_s1 + $0x428] sm:$0xff]  ;;  %1056 = vst [vmem:[#allocation2 + $0x90] sm:$0xff] %v2992_v52  ;;  %1057 = vst [vmem:[#allocation2 + $0x98] sm:$0x3] %v2992_v52  ;;  %v1215_v23 = vld [vmem:[#allocation3 + $0x1b8] sm:$0xff] }
  0x85   : > { %2683 = vmatprep.subr.mxu0 %v505_v55  ;;  %814 = vmatprep.mubr.f32.mxu0 %v2112_v32  ;;  %1059 = vst [vmem:[#allocation2 + $0x10] sm:$0x1] %v2992_v52  ;;  %1060 = vst [vmem:[#allocation2 + $0x20] sm:$0x1] %v2992_v52  ;;  %v1199_v32 = vld [vmem:[#allocation3 + $0x138] sm:$0xff] }
  0x86   : > { %2684 = vmatpush3.msra.mxu0 %v505_v55  ;;  %919 = vmatprep.mubr.f32.mxu1 %v3470_v56  ;;  %v2114_v56 = vld [vmem:[%s3277_s8 + $0x181] sm:$0xff]  ;;  %1061 = vst [vmem:[#allocation2 + $0x30] sm:$0x1] %v2992_v52  ;;  %1062 = vst [vmem:[#allocation2 + $0x40] sm:$0x1] %v2992_v52  ;;  %v1178_v55 = vld [vmem:[#allocation3 + $0x90] sm:$0xff] }
  0x87   : > { %815 = vmatmul.mubr.f32.gmra.mxu0 %v2104_v57  ;;  %2685 = vmatprep.subr.mxu0 %v504_v35  ;;  %1063 = vst [vmem:[#allocation2 + $0x50] sm:$0x1] %v2992_v52  ;;  %1064 = vst [vmem:[#allocation2 + $0x60] sm:$0x1] %v2992_v52  ;;  %v1162_v57 = vld [vmem:[#allocation3 + $0x10] sm:$0xff] }
  0x88   : > { %2686 = vmatpush3.msra.mxu0 %v504_v35  ;;  %920 = vmatmul.mubr.f32.gmra.mxu1 %v3480_v59  ;;  %v500_v59 = vld [vmem:[%s4192_s1 + $0x418] sm:$0xff]  ;;  %1065 = vst [vmem:[#allocation2 + $0x70] sm:$0x1] %v2992_v52  ;;  %1066 = vst [vmem:[#allocation2 + $0x80] sm:$0x1] %v2992_v52  ;;  %v1214_v35 = vld [vmem:[#allocation3 + $0x1b0] sm:$0xff] }
  0x89   : > { %2687 = vmatprep.subr.mxu0 %v503_v58  ;;  %819 = vmatprep.mubr.f32.mxu0 %v2113_v44  ;;  %1069 = vst [vmem:[#allocation2 + $0x19] sm:$0x1] %v2992_v52  ;;  %1070 = vst [vmem:[#allocation2 + $0x29] sm:$0x1] %v2992_v52  ;;  %v1198_v44 = vld [vmem:[#allocation3 + $0x130] sm:$0xff] }
  0x8a   : > { %2688 = vmatpush3.msra.mxu0 %v503_v58  ;;  %924 = vmatprep.mubr.f32.mxu1 %v3507_v4  ;;  %v2131_v4 = vld [vmem:[%s3277_s8 + $0x110] sm:$0xff]  ;;  %1071 = vst [vmem:[#allocation2 + $0x39] sm:$0x1] %v2992_v52  ;;  %1072 = vst [vmem:[#allocation2 + $0x49] sm:$0x1] %v2992_v52  ;;  %v1177_v58 = vld [vmem:[#allocation3 + $0x88] sm:$0xff] }
  0x8b   : > { %820 = vmatmul.mubr.f32.gmra.mxu0 %v2105_v60  ;;  %2689 = vmatprep.subr.mxu0 %v502_v47  ;;  %1073 = vst [vmem:[#allocation2 + $0x59] sm:$0x1] %v2992_v52  ;;  %1074 = vst [vmem:[#allocation2 + $0x69] sm:$0x1] %v2992_v52  ;;  %v1161_v60 = vld [vmem:[#allocation3 + $0x8] sm:$0xff] }
  0x8c   : > { %2690 = vmatpush3.msra.mxu0 %v502_v47  ;;  %925 = vmatmul.mubr.f32.gmra.mxu1 %v3517_v7  ;;  %v2139_v7 = vld [vmem:[%s3277_s8 + $0x81] sm:$0xff]  ;;  %1075 = vst [vmem:[#allocation2 + $0x79] sm:$0x1] %v2992_v52  ;;  %1076 = vst [vmem:[#allocation2 + $0x89] sm:$0x1] %v2992_v52 }
  0x8d   : > { %2691 = vmatprep.subr.mxu0 %v501_v61  ;;  %824 = vmatprep.mubr.f32.mxu0 %v2114_v56  ;;  %1068 = vst [vmem:[#allocation2 + $0x9] sm:$0x1] %v2992_v52  ;;  %1058 = vst [vmem:[#allocation2] sm:$0x1] %v2992_v52  ;;  %v1213_v47 = vld [vmem:[#allocation3 + $0x1a8] sm:$0xff] }
  0x8e   : > { %2692 = vmatpush3.msra.mxu0 %v501_v61  ;;  %929 = vmatprep.mubr.f32.mxu1 %v3544_v19  ;;  %v1170_v19 = vld [vmem:[#allocation3 + $0x50] sm:$0xff]  ;;  %1067 = vst [vmem:[#allocation2 + $0x90] sm:$0x1] %v2992_v52  ;;  %1077 = vst [vmem:[#allocation2 + $0x99] sm:$0x1] %v2992_v52  ;;  %v1176_v61 = vld [vmem:[#allocation3 + $0x80] sm:$0xff] }
  0x8f   : > { %825 = vmatmul.mubr.f32.gmra.mxu0 %v2106_v62  ;;  %2693 = vmatprep.subr.mxu0 %v500_v59  ;;  %v1197_v56 = vld [vmem:[#allocation3 + $0x128] sm:$0xff]  ;;  %v1160_v62 = vld [vmem:[#allocation3] sm:$0xff] }
  0x90   : > { %2694 = vmatpush3.msra.mxu0 %v500_v59  ;;  %930 = vmatmul.mubr.f32.gmra.mxu1 %v3554_v24  ;;  %v1206_v24 = vld [vmem:[#allocation3 + $0x170] sm:$0xff]  ;;  %v1095_v59 = vld [vmem:[#allocation2 + $0x1] sm:$0xff] }
  0x91   : > { %2695 = vmatprep.subr.mxu0 %v499_v63  ;;  %829 = vmatprep.mubr.f32.mxu0 %v2115_v0 }
  0x92   : > { %2696 = vmatpush3.msra.mxu0 %v499_v63  ;;  %934 = vmatprep.mubr.f32.mxu1 %v2131_v4  ;;  %v1212_v63 = vld [vmem:[#allocation3 + $0x1a0] sm:$0xff]  ;;  %v1195_v4 = vld [vmem:[#allocation3 + $0x118] sm:$0xff] }
  0x93   : > { %830 = vmatmul.mubr.f32.gmra.mxu0 %v2107_v2  ;;  %2697 = vmatprep.subr.mxu0 %v498_v3  ;;  %v1196_v2 = vld [vmem:[#allocation3 + $0x120] sm:$0xff] }
  0x94   : > { %2698 = vmatpush3.msra.mxu0 %v498_v3  ;;  %935 = vmatmul.mubr.f32.gmra.mxu1 %v2123_v5  ;;  %v1087_v0 = vld [vmem:[#allocation2] sm:$0xff]  ;;  %v1211_v3 = vld [vmem:[#allocation3 + $0x198] sm:$0xff]  ;;  %v1210_v5 = vld [vmem:[#allocation3 + $0x190] sm:$0xff] }
  0x95   : > { %2699 = vmatprep.subr.mxu0 %v497_v6  ;;  %2701 = vmatprep.mubr.f32.mxu0 %v3350_v17  ;;  %v1174_v17 = vld [vmem:[#allocation3 + $0x70] sm:$0xff] }
  0x96   : > { %2700 = vmatpush3.msra.mxu0 %v497_v6  ;;  %2397 = vmatprep.subr.mxu1 %v1191_v9  ;;  %v1255_v6 = vld [vmem:[#allocation3 + $0x2f8] sm:$0xff] }
  0x97   : > { %2702 = vmatmul.mubr.f32.vlgmr.msra.gmra.mxu0 %v3387_v29  ;;  %2398 = vmatpush3.msra.mxu1 %v1175_v10  ;;  %v1189_v29 = vld [vmem:[#allocation3 + $0xe8] sm:$0xff]  ;;  %v1239_v9 = vld [vmem:[#allocation3 + $0x278] sm:$0xff] }
  0x98   : > { %2704 = vmatprep.mubr.f32.mxu0 %v3424_v41  ;;  %2399 = vmatprep.subr.mxu1 %v1190_v12  ;;  %v1173_v41 = vld [vmem:[#allocation3 + $0x68] sm:$0xff]  ;;  %v1254_v12 = vld [vmem:[#allocation3 + $0x2f0] sm:$0xff] }
  0x99   : > { %2400 = vmatpush3.msra.mxu1 %v1174_v17  ;;  %1375 = vmatprep.mubr.f32.mxu1 %v1095_v59  ;;  %v1209_v10 = vld [vmem:[#allocation3 + $0x188] sm:$0xff] }
  0x9a   : > { %2401 = vmatprep.subr.mxu1 %v1189_v29  ;;  %v1193_v17 = vld [vmem:[#allocation3 + $0x108] sm:$0xff]  ;;  %v1238_v29 = vld [vmem:[#allocation3 + $0x270] sm:$0xff] }
  0x9b   : > { %2705 = vmatmul.mubr.f32.gmra.mxu0 %v3461_v53  ;;  %2402 = vmatpush3.msra.mxu1 %v1173_v41  ;;  %v1188_v53 = vld [vmem:[#allocation3 + $0xe0] sm:$0xff] }
  0x9c   : > { %2707 = vmatprep.mubr.f32.mxu0 %v3498_v1  ;;  %2403 = vmatprep.subr.mxu1 %v1188_v53  ;;  %v1172_v1 = vld [vmem:[#allocation3 + $0x60] sm:$0xff]  ;;  %v1253_v53 = vld [vmem:[#allocation3 + $0x2e8] sm:$0xff] }
  0x9d   : > { %2404 = vmatpush3.msra.mxu1 %v1172_v1  ;;  %v1208_v41 = vld [vmem:[#allocation3 + $0x180] sm:$0xff] }
  0x9e   : > { %2405 = vmatprep.subr.mxu1 %v1187_v13  ;;  %v1192_v1 = vld [vmem:[#allocation3 + $0x100] sm:$0xff]  ;;  %v1237_v13 = vld [vmem:[#allocation3 + $0x268] sm:$0xff] }
  0x9f   : > { %2708 = vmatmul.mubr.f32.gmra.mxu0 %v3535_v15  ;;  %v1223_v15 = vld [vmem:[#allocation3 + $0x1f8] sm:$0xff]  ;;  %2406 = vmatpush3.msra.mxu1 %v1171_v14 }
  0xa0   : > { %2710 = vmatprep.mubr.f32.mxu0 %v3572_v31  ;;  %2453 = vmatprep.subr.mxu0 %v1223_v15  ;;  %v1220_v31 = vld [vmem:[#allocation3 + $0x1e0] sm:$0xff]  ;;  %v1287_v14 = vld [vmem:[#allocation3 + $0x3f8] sm:$0xff] }
  0xa1   : > { %2407 = vmatprep.subr.mxu1 %v1186_v16  ;;  %2454 = vmatpush3.msra.mxu0 %v1207_v18  ;;  %v1252_v15 = vld [vmem:[#allocation3 + $0x2e0] sm:$0xff]  ;;  %v1251_v18 = vld [vmem:[#allocation3 + $0x2d8] sm:$0xff] }
  0xa2   : > { %2408 = vmatpush3.msra.mxu1 %v1170_v19  ;;  %2455 = vmatprep.subr.mxu0 %v1222_v21  ;;  %v1236_v16 = vld [vmem:[#allocation3 + $0x260] sm:$0xff]  ;;  %v1235_v19 = vld [vmem:[#allocation3 + $0x258] sm:$0xff]  ;;  %v1250_v21 = vld [vmem:[#allocation3 + $0x2d0] sm:$0xff] }
  0xa3   : > { %2711 = vmatmul.mubr.f32.gmra.mxu0 %v2139_v7  ;;  %2409 = vmatprep.subr.mxu1 %v1185_v22  ;;  %v1194_v7 = vld [vmem:[#allocation3 + $0x110] sm:$0xff] }
  0xa4   : > { %2456 = vmatpush3.msra.mxu0 %v1206_v24  ;;  %2410 = vmatpush3.msra.mxu1 %v1169_v25  ;;  %v1234_v22 = vld [vmem:[#allocation3 + $0x250] sm:$0xff]  ;;  %v1249_v24 = vld [vmem:[#allocation3 + $0x2c8] sm:$0xff] }
  0xa5   : > { %2457 = vmatprep.subr.mxu0 %v1221_v26  ;;  %2411 = vmatprep.subr.mxu1 %v1184_v27  ;;  %v1233_v25 = vld [vmem:[#allocation3 + $0x248] sm:$0xff]  ;;  %v1248_v26 = vld [vmem:[#allocation3 + $0x2c0] sm:$0xff] }
  0xa6   : > { %2458 = vmatpush3.msra.mxu0 %v1205_v28  ;;  %2412 = vmatpush3.msra.mxu1 %v1168_v30  ;;  %v1232_v27 = vld [vmem:[#allocation3 + $0x240] sm:$0xff]  ;;  %v1247_v28 = vld [vmem:[#allocation3 + $0x2b8] sm:$0xff] }
  0xa7   : > { %2459 = vmatprep.subr.mxu0 %v1220_v31  ;;  %2413 = vmatprep.subr.mxu1 %v1183_v33  ;;  %v1231_v30 = vld [vmem:[#allocation3 + $0x238] sm:$0xff]  ;;  %v1246_v31 = vld [vmem:[#allocation3 + $0x2b0] sm:$0xff] }
  0xa8   : > { %2460 = vmatpush3.msra.mxu0 %v1204_v34  ;;  %2414 = vmatpush3.msra.mxu1 %v1167_v36  ;;  %v1230_v33 = vld [vmem:[#allocation3 + $0x230] sm:$0xff]  ;;  %v1245_v34 = vld [vmem:[#allocation3 + $0x2a8] sm:$0xff] }
  0xa9   : > { %2461 = vmatprep.subr.mxu0 %v1219_v37  ;;  %2415 = vmatprep.subr.mxu1 %v1182_v38  ;;  %v1229_v36 = vld [vmem:[#allocation3 + $0x228] sm:$0xff]  ;;  %v1244_v37 = vld [vmem:[#allocation3 + $0x2a0] sm:$0xff] }
  0xaa   : > { %2462 = vmatpush3.msra.mxu0 %v1203_v39  ;;  %2416 = vmatpush3.msra.mxu1 %v1166_v40  ;;  %v1228_v38 = vld [vmem:[#allocation3 + $0x220] sm:$0xff]  ;;  %v1243_v39 = vld [vmem:[#allocation3 + $0x298] sm:$0xff] }
  0xab   : > { %2463 = vmatprep.subr.mxu0 %v1218_v42  ;;  %2417 = vmatprep.subr.mxu1 %v1181_v43  ;;  %v1227_v40 = vld [vmem:[#allocation3 + $0x218] sm:$0xff]  ;;  %v1242_v42 = vld [vmem:[#allocation3 + $0x290] sm:$0xff] }
  0xac   : > { %2464 = vmatpush3.msra.mxu0 %v1202_v45  ;;  %2418 = vmatpush3.msra.mxu1 %v1165_v46  ;;  %v1226_v43 = vld [vmem:[#allocation3 + $0x210] sm:$0xff]  ;;  %v1241_v45 = vld [vmem:[#allocation3 + $0x288] sm:$0xff] }
  0xad   : > { %2465 = vmatprep.subr.mxu0 %v1217_v48  ;;  %2419 = vmatprep.subr.mxu1 %v1180_v49  ;;  %v1225_v46 = vld [vmem:[#allocation3 + $0x208] sm:$0xff]  ;;  %v1240_v48 = vld [vmem:[#allocation3 + $0x280] sm:$0xff] }
  0xae   : > { %2466 = vmatpush3.msra.mxu0 %v1201_v50  ;;  %2420 = vmatpush3.msra.mxu1 %v1164_v8  ;;  %v1224_v49 = vld [vmem:[#allocation3 + $0x200] sm:$0xff]  ;;  %v3681_v50 = vld [vmem:[#allocation3 + $0x478] sm:$0xff] }
  0xaf   : > { %2467 = vmatprep.subr.mxu0 %v1216_v51  ;;  %2421 = vmatprep.subr.mxu1 %v1179_v11  ;;  %4203 = vst [vmem:[#allocation9_spill] sm:$0xff] %v3681_v50 }
  0xb0   : > { %2468 = vmatpush3.msra.mxu0 %v1200_v20  ;;  %2422 = vmatpush3.msra.mxu1 %v1163_v54 }
  0xb1   : > { %2469 = vmatprep.subr.mxu0 %v1215_v23  ;;  %2423 = vmatprep.subr.mxu1 %v1178_v55 }
  0xb2   : > { %2470 = vmatpush3.msra.mxu0 %v1199_v32  ;;  %2424 = vmatpush3.msra.mxu1 %v1162_v57 }
  0xb3   : > { %2471 = vmatprep.subr.mxu0 %v1214_v35  ;;  %2425 = vmatprep.subr.mxu1 %v1177_v58 }
  0xb4   : > { %2472 = vmatpush3.msra.mxu0 %v1198_v44  ;;  %2426 = vmatpush3.msra.mxu1 %v1161_v60 }
  0xb5   : > { %2473 = vmatprep.subr.mxu0 %v1213_v47  ;;  %2427 = vmatprep.subr.mxu1 %v1176_v61 }
  0xb6   : > { %2474 = vmatpush3.msra.mxu0 %v1197_v56  ;;  %2428 = vmatpush3.msra.mxu1 %v1160_v62 }
  0xb7   : > { %2475 = vmatprep.subr.mxu0 %v1212_v63  ;;  %1376 = vmatmul.mubr.f32.vlgmr.msra.gmra.mxu1 %v1087_v0 }
  0xb8   : > { %2476 = vmatpush3.msra.mxu0 %v1196_v2  ;;  %2509 = vmatprep.subr.mxu1 %v1255_v6 }
  0xb9   : > { %2477 = vmatprep.subr.mxu0 %v1211_v3  ;;  %2510 = vmatpush3.msra.mxu1 %v1239_v9 }
  0xba   : > { %2478 = vmatpush3.msra.mxu0 %v1195_v4  ;;  %2511 = vmatprep.subr.mxu1 %v1254_v12 }
  0xbb   : > { %2479 = vmatprep.subr.mxu0 %v1210_v5  ;;  %2512 = vmatpush3.msra.mxu1 %v1238_v29 }
  0xbc   : > { %2480 = vmatpush3.msra.mxu0 %v1194_v7  ;;  %2513 = vmatprep.subr.mxu1 %v1253_v53 }
  0xbd   : > { %2481 = vmatprep.subr.mxu0 %v1209_v10  ;;  %2514 = vmatpush3.msra.mxu1 %v1237_v13 }
  0xbe   : > { %2482 = vmatpush3.msra.mxu0 %v1193_v17  ;;  %2515 = vmatprep.subr.mxu1 %v1252_v15 }
  0xbf   : > { %2483 = vmatprep.subr.mxu0 %v1208_v41  ;;  %2516 = vmatpush3.msra.mxu1 %v1236_v16 }
  0xc0   : > { %2484 = vmatpush3.msra.mxu0 %v1192_v1  ;;  %2517 = vmatprep.subr.mxu1 %v1251_v18 }
  0xc1   : > { %2565 = vmatprep.subr.mxu0 %v1287_v14  ;;  %2518 = vmatpush3.msra.mxu1 %v1235_v19 }
  0xc2   : > { %2519 = vmatprep.subr.mxu1 %v1250_v21 }
  0xc3   : > { %2520 = vmatpush3.msra.mxu1 %v1234_v22 }
  0xc4   : > { %2521 = vmatprep.subr.mxu1 %v1249_v24 }
  0xc5   : > { %2522 = vmatpush3.msra.mxu1 %v1233_v25 }
  0xc6   : > { %2523 = vmatprep.subr.mxu1 %v1248_v26 }
  0xc7   : > { %2524 = vmatpush3.msra.mxu1 %v1232_v27 }
  0xc8   : > { %2525 = vmatprep.subr.mxu1 %v1247_v28 }
  0xc9   : > { %2526 = vmatpush3.msra.mxu1 %v1231_v30 }
  0xca   : > { %2527 = vmatprep.subr.mxu1 %v1246_v31 }
  0xcb   : > { %2528 = vmatpush3.msra.mxu1 %v1230_v33 }
  0xcc   : > { %2529 = vmatprep.subr.mxu1 %v1245_v34 }
  0xcd   : > { %2530 = vmatpush3.msra.mxu1 %v1229_v36 }
  0xce   : > { %2531 = vmatprep.subr.mxu1 %v1244_v37  ;;  %v2140_v37 = vld [vmem:[%s4195_s4] ss:$0 sm:$0xff] }
  0xcf   : > { %2532 = vmatpush3.msra.mxu1 %v1228_v38 }
  0xd0   : > { %2533 = vmatprep.subr.mxu1 %v1243_v39 }
  0xd1   : > { %2534 = vmatpush3.msra.mxu1 %v1227_v40 }
  0xd2   : > { %2535 = vmatprep.subr.mxu1 %v1242_v42 }
  0xd3   : > { %2536 = vmatpush3.msra.mxu1 %v1226_v43 }
  0xd4   : > { %2537 = vmatprep.subr.mxu1 %v1241_v45 }
  0xd5   : > { %2538 = vmatpush3.msra.mxu1 %v1225_v46 }
  0xd6   : > { %2539 = vmatprep.subr.mxu1 %v1240_v48 }
  0xd7   : > { %2540 = vmatpush3.msra.mxu1 %v1224_v49 }
  0xd8   : > { %2713 = vmatprep.subr.mxu1 %v3681_v50 }
 0x105   : > { %v2181_v8 = vpop.f32.mrf.mxu0 }
 0x107   : > { %v2182_v51 = vpop.f32.mrf.mxu0 }
 0x108   : > { %v2237_v11 = vpop.f32.mrf.mxu1  ;;  %v2183_v33 = vadd.f32 %v2182_v51, %v2181_v8 }
 0x10a   : > { %v2238_v52 = vpop.f32.mrf.mxu1  ;;  %v587_v45 = vadd.f32 %v2183_v33, %v2140_v37 }
 0x10b   : > { %v2184_v20 = vpop.f32.mrf.mxu0  ;;  %v2239_v46 = vadd.f32 %v2238_v52, %v2237_v11 }
 0x10d   : > { %v2185_v54 = vpop.f32.mrf.mxu0 }
 0x10e   : > { %v2186_v31 = vadd.f32 %v2185_v54, %v2184_v20 }
 0x10f   : > { %v2240_v23 = vpop.f32.mrf.mxu1 }
 0x110   : > { %v592_v40 = vadd.f32 %v2186_v31, %v2140_v37 }
 0x111   : > { %v2241_v55 = vpop.f32.mrf.mxu1  ;;  %v2187_v32 = vpop.f32.mrf.mxu0 }
 0x112   : > { %v2242_v42 = vadd.f32 %v2241_v55, %v2240_v23 }
 0x113   : > { %v2188_v57 = vpop.f32.mrf.mxu0 }
 0x114   : > { %v2189_v48 = vadd.f32 %v2188_v57, %v2187_v32 }
 0x115   : > { %v3684_v35 = vpop.f32.mrf.mxu1 }
 0x117   : > { %v3686_v58 = vpop.f32.mrf.mxu1  ;;  %v2190_v44 = vpop.f32.mrf.mxu0 }
 0x118   : > { %v2245_v23 = vadd.f32 %v3686_v58, %v3684_v35 }
 0x119   : > { %v2191_v60 = vpop.f32.mrf.mxu0 }
 0x11a   : > { %v2192_v43 = vadd.f32 %v2191_v60, %v2190_v44 }
 0x11b   : > { %v2246_v47 = vpop.f32.mrf.mxu1 }
 0x11d   : > { %v2247_v61 = vpop.f32.mrf.mxu1  ;;  %v2193_v56 = vpop.f32.mrf.mxu0 }
 0x11f   : > { %v2194_v62 = vpop.f32.mrf.mxu0 }
 0x120   : > { %v2195_v49 = vadd.f32 %v2194_v62, %v2193_v56 }
 0x121   : > { %v2249_v59 = vpop.f32.mrf.mxu1 }
 0x122   : > { %v607_v55 = vadd.f32 %v2195_v49, %v2140_v37 }
 0x123   : > { %v2250_v63 = vpop.f32.mrf.mxu1  ;;  %v2196_v0 = vpop.f32.mrf.mxu0 }
 0x124   : > { %v2251_v52 = vadd.f32 %v2250_v63, %v2249_v59 }
 0x125   : > { %v2197_v2 = vpop.f32.mrf.mxu0 }
 0x126   : > { %v2198_v51 = vadd.f32 %v2197_v2, %v2196_v0  ;;  %v712_v33 = vadd.f32 %v2251_v52, %v607_v55 }
 0x127   : > { %v2252_v3 = vpop.f32.mrf.mxu1 }
 0x128   : > { %v612_v56 = vadd.f32 %v2198_v51, %v2140_v37 }
 0x129   : > { %v2253_v4 = vpop.f32.mrf.mxu1  ;;  %v3688_v5 = vpop.f32.mrf.mxu0 }
 0x12a   : > { %v2254_v62 = vadd.f32 %v2253_v4, %v2252_v3 }
 0x12b   : > { %v3690_v6 = vpop.f32.mrf.mxu0 }
 0x12c   : > { %v2201_v35 = vadd.f32 %v3690_v6, %v3688_v5 }
 0x12d   : > { %v3692_v7 = vpop.f32.mrf.mxu1 }
 0x12e   : > { %4204 = vst [vmem:[#allocation10_spill] sm:$0xff] %v3692_v7  ;;  %v602_v7 = vadd.f32 %v2192_v43, %v2140_v37 }
 0x12f   : > { %v3694_v9 = vpop.f32.mrf.mxu1  ;;  %v2202_v10 = vpop.f32.mrf.mxu0 }
 0x130   : > { %4205 = vst [vmem:[#allocation11_spill] sm:$0xff] %v3694_v9  ;;  %v697_v9 = vadd.f32 %v2242_v42, %v592_v40 }
 0x131   : > { %v2203_v12 = vpop.f32.mrf.mxu0 }
 0x132   : > { %v2204_v0 = vadd.f32 %v2203_v12, %v2202_v10 }
 0x133   : > { %v3696_v17 = vpop.f32.mrf.mxu1 }
 0x134   : > { %4206 = vst [vmem:[#allocation12_spill] sm:$0xff] %v3696_v17  ;;  %v597_v17 = vadd.f32 %v2189_v48, %v2140_v37 }
 0x135   : > { %v3698_v29 = vpop.f32.mrf.mxu1  ;;  %v2293_v41 = vpop.f32.mrf.mxu0  ;;  %v4215_v6 = vld [vmem:[#allocation10_spill] sm:$0xff] }
 0x136   : > { %4207 = vst [vmem:[#allocation13_spill] sm:$0xff] %v3698_v29  ;;  %v692_v29 = vadd.f32 %v2239_v46, %v587_v45 }
 0x137   : > { %v2294_v53 = vpop.f32.mrf.mxu0 }
 0x138   : > { %v2349_v1 = vpop.f32.mrf.mxu1 }
 0x13a   : > { %v2350_v14 = vpop.f32.mrf.mxu1 }
 0x13b   : > { %v2296_v13 = vpop.f32.mrf.mxu0  ;;  %v4211_v3 = vld [vmem:[#allocation12_spill] sm:$0xff] }
 0x13c   : > { %v2352_v16 = vpop.f32.mrf.mxu1 }
 0x13d   : > { %v2297_v15 = vpop.f32.mrf.mxu0  ;;  %v4212_v4 = vld [vmem:[#allocation13_spill] sm:$0xff] }
 0x13e   : > { %v2353_v19 = vpop.f32.mrf.mxu1  ;;  %v2298_v8 = vadd.f32 %v2297_v15, %v2296_v13  ;;  %v702_v15 = vadd.f32 %v2245_v23, %v597_v17  ;;  %v2260_v10 = vadd.f32 %v4212_v4, %v4211_v3  ;;  %v1285_v3 = vld [vmem:[#allocation3 + $0x3e8] sm:$0xff] }
 0x13f   : > { %v2299_v18 = vpop.f32.mrf.mxu0  ;;  %v2354_v57 = vadd.f32 %v2353_v19, %v2352_v16  ;;  %v717_v16 = vadd.f32 %v2254_v62, %v612_v56  ;;  %v622_v19 = vadd.f32 %v2204_v0, %v2140_v37 }
 0x140   : > { %v3700_v22 = vpop.f32.mrf.mxu1  ;;  %v802_v32 = vadd.f32 %v2298_v8, %v697_v9 }
 0x141   : > { %v2300_v21 = vpop.f32.mrf.mxu0  ;;  %4208 = vst [vmem:[#allocation14_spill] sm:$0xff] %v3700_v22  ;;  %v2295_v22 = vadd.f32 %v2294_v53, %v2293_v41  ;;  %v2351_v41 = vadd.f32 %v2350_v14, %v2349_v1 }
 0x142   : > { %v3702_v25 = vpop.f32.mrf.mxu1  ;;  %v2301_v53 = vadd.f32 %v2300_v21, %v2299_v18  ;;  %v907_v9 = vadd.f32 %v2354_v57, %v802_v32 }
 0x143   : > { %v2302_v24 = vpop.f32.mrf.mxu0  ;;  %4209 = vst [vmem:[#allocation15_spill] sm:$0xff] %v3702_v25  ;;  %v2248_v25 = vadd.f32 %v2247_v61, %v2246_v47  ;;  %v797_v61 = vadd.f32 %v2295_v22, %v692_v29  ;;  %v4216_v22 = vld [vmem:[#allocation11_spill] sm:$0xff] }
 0x144   : > { %v2358_v27 = vpop.f32.mrf.mxu1  ;;  %v807_v1 = vadd.f32 %v2301_v53, %v702_v15 }
 0x145   : > { %v2303_v26 = vpop.f32.mrf.mxu0  ;;  %v707_v47 = vadd.f32 %v2248_v25, %v602_v7  ;;  %v902_v5 = vadd.f32 %v2351_v41, %v797_v61 }
 0x146   : > { %v2359_v30 = vpop.f32.mrf.mxu1  ;;  %v2304_v60 = vadd.f32 %v2303_v26, %v2302_v24  ;;  %v2257_v24 = vadd.f32 %v4216_v22, %v4215_v6  ;;  %v1265_v6 = vld [vmem:[#allocation3 + $0x348] sm:$0xff] }
 0x147   : > { %v2305_v28 = vpop.f32.mrf.mxu0  ;;  %v2360_v63 = vadd.f32 %v2359_v30, %v2358_v27 }
 0x148   : > { %v3704_v36 = vpop.f32.mrf.mxu1  ;;  %v812_v59 = vadd.f32 %v2304_v60, %v707_v47  ;;  %v4213_v14 = vld [vmem:[#allocation14_spill] sm:$0xff] }
 0x149   : > { %v2306_v34 = vpop.f32.mrf.mxu0  ;;  %4210 = vst [vmem:[#allocation16_spill] sm:$0xff] %v3704_v36 }
 0x14a   : > { %v3709_v39 = vpop.f32.mrf.mxu1  ;;  %v2307_v12 = vadd.f32 %v2306_v34, %v2305_v28  ;;  %v4214_v17 = vld [vmem:[#allocation15_spill] sm:$0xff]  ;;  %v917_v28 = vadd.f32 %v2360_v63, %v812_v59  ;;  %v727_v34 = vadd.f32 %v2260_v10, %v622_v19  ;;  %v1269_v10 = vld [vmem:[#allocation3 + $0x368] sm:$0xff] }
 0x14b   : > { %v2308_v38 = vpop.f32.mrf.mxu0  ;;  %v2357_v18 = vadd.f32 %v4214_v17, %v4213_v14  ;;  %v1286_v63 = vld [vmem:[#allocation3 + $0x3f0] sm:$0xff]  ;;  %v1267_v14 = vld [vmem:[#allocation3 + $0x358] sm:$0xff] }
 0x14c   : > { %v2364_v20 = vpop.f32.mrf.mxu1  ;;  %v817_v42 = vadd.f32 %v2307_v12, %v712_v33 }
 0x14d   : > { %v2309_v50 = vpop.f32.mrf.mxu0 }
 0x14e   : > { %v2365_v36 = vpop.f32.mrf.mxu1  ;;  %v2310_v58 = vadd.f32 %v2309_v50, %v2308_v38  ;;  %v617_v50 = vadd.f32 %v2201_v35, %v2140_v37 }
 0x14f   : > { %v2311_v54 = vpop.f32.mrf.mxu0  ;;  %v2366_v26 = vadd.f32 %v2365_v36, %v2364_v20  ;;  %v912_v36 = vadd.f32 %v2357_v18, %v807_v1  ;;  %v1283_v1 = vld [vmem:[#allocation3 + $0x3d8] sm:$0xff]  ;;  %v1282_v18 = vld [vmem:[#allocation3 + $0x3d0] sm:$0xff] }
 0x150   : > { %v3713_v11 = vpop.f32.mrf.mxu1  ;;  %v822_v25 = vadd.f32 %v2310_v58, %v717_v16  ;;  %v4217_v43 = vld [vmem:[#allocation16_spill] sm:$0xff]  ;;  %v722_v20 = vadd.f32 %v2257_v24, %v617_v50  ;;  %v1270_v16 = vld [vmem:[#allocation3 + $0x370] sm:$0xff]  ;;  %v1281_v50 = vld [vmem:[#allocation3 + $0x3c8] sm:$0xff] }
 0x151   : > { %v2312_v44 = vpop.f32.mrf.mxu0  ;;  %v2363_v45 = vadd.f32 %v3709_v39, %v4217_v43  ;;  %v1280_v24 = vld [vmem:[#allocation3 + $0x3c0] sm:$0xff]  ;;  %v1277_v43 = vld [vmem:[#allocation3 + $0x3a8] sm:$0xff] }
 0x152   : > { %v2368_v13 = vpop.f32.mrf.mxu1  ;;  %v2313_v49 = vadd.f32 %v2312_v44, %v2311_v54  ;;  %v927_v23 = vadd.f32 %v2366_v26, %v822_v25  ;;  %v1264_v26 = vld [vmem:[#allocation3 + $0x340] sm:$0xff] }
 0x153   : > { %v2314_v2 = vpop.f32.mrf.mxu0  ;;  %v922_v54 = vadd.f32 %v2363_v45, %v817_v42  ;;  %v2369_v60 = vadd.f32 %v2368_v13, %v3713_v11  ;;  %v1103_v11 = vld [vmem:[#allocation2 + $0x2] sm:$0xff]  ;;  %v1262_v42 = vld [vmem:[#allocation3 + $0x330] sm:$0xff] }
 0x154   : > { %v2370_v7 = vpop.f32.mrf.mxu1  ;;  %v827_v44 = vadd.f32 %v2313_v49, %v722_v20  ;;  %v1261_v45 = vld [vmem:[#allocation3 + $0x328] sm:$0xff]  ;;  %v1259_v20 = vld [vmem:[#allocation3 + $0x318] sm:$0xff] }
 0x155   : > { %v2315_v31 = vpop.f32.mrf.mxu0 }
 0x156   : > { %v2316_v30 = vadd.f32 %v2315_v31, %v2314_v2  ;;  %v2371_v46 = vpop.f32.mrf.mxu1  ;;  %v932_v35 = vadd.f32 %v2369_v60, %v827_v44  ;;  %v1271_v31 = vld [vmem:[#allocation3 + $0x378] sm:$0xff]  ;;  %v4218_v44 = vld [vmem:[#allocation9_spill] sm:$0xff]  ;;  %v1302_v60 = vld [vmem:[#allocation3 + $0x470] sm:$0xff] }
 0x157   : > { %v2703_v29 = vpop.f32.mrf.mxu0  ;;  %v2372_v52 = vadd.f32 %v2371_v46, %v2370_v7  ;;  %v1284_v7 = vld [vmem:[#allocation3 + $0x3e0] sm:$0xff] }
 0x158   : > { %v1012_v21 = vadd.f32 %v2703_v29, %v907_v9  ;;  %v832_v55 = vadd.f32 %v2316_v30, %v727_v34  ;;  %v1268_v29 = vld [vmem:[#allocation3 + $0x360] sm:$0xff]  ;;  %v1263_v30 = vld [vmem:[#allocation3 + $0x338] sm:$0xff] }
 0x159   : > { %v1006_v27 = vpop.f32.mrf.mxu0 }
 0x15a   : > { %v3723_v38 = vmax.f32 %v1012_v21, 0.0  ;;  %v1007_v40 = vadd.f32 %v1006_v27, %v902_v5  ;;  %v937_v61 = vadd.f32 %v2372_v52, %v832_v55  ;;  %v1266_v5 = vld [vmem:[#allocation3 + $0x350] sm:$0xff]  ;;  %v1279_v27 = vld [vmem:[#allocation3 + $0x3b8] sm:$0xff] }
 0x15b   : > { %v2706_v48 = vpop.f32.mrf.mxu0  ;;  %v1258_v52 = vld [vmem:[#allocation3 + $0x310] sm:$0xff] }
 0x15c   : > { %1080 = vst [vmem:[#allocation2 + $0x21] sm:$0xff] %v3723_v38  ;;  %v3728_v37 = vmax.f32 %v1007_v40, 0.0  ;;  %v1022_v8 = vadd.f32 %v2706_v48, %v917_v28  ;;  %v1278_v28 = vld [vmem:[#allocation3 + $0x3b0] sm:$0xff]  ;;  %v1276_v48 = vld [vmem:[#allocation3 + $0x3a0] sm:$0xff] }
 0x15d   : > { %v1016_v51 = vpop.f32.mrf.mxu0 }
 0x15e   : > { %1079 = vst [vmem:[#allocation2 + $0x11] sm:$0xff] %v3728_v37  ;;  %v3731_v32 = vmax.f32 %v1022_v8, 0.0  ;;  %v1017_v57 = vadd.f32 %v1016_v51, %v912_v36  ;;  %1380 = vmatprep.mubr.f32.mxu1 %v3728_v37  ;;  %v1260_v8 = vld [vmem:[#allocation3 + $0x320] sm:$0xff]  ;;  %v1275_v36 = vld [vmem:[#allocation3 + $0x398] sm:$0xff] }
 0x15f   : > { %v2709_v39 = vpop.f32.mrf.mxu0 }
 0x160   : > { %1082 = vst [vmem:[#allocation2 + $0x41] sm:$0xff] %v3731_v32  ;;  %v3736_v56 = vmax.f32 %v1017_v57, 0.0  ;;  %v1032_v62 = vadd.f32 %v2709_v39, %v927_v23  ;;  %v1274_v23 = vld [vmem:[#allocation3 + $0x390] sm:$0xff]  ;;  %v1273_v57 = vld [vmem:[#allocation3 + $0x388] sm:$0xff] }
 0x161   : > { %v1026_v0 = vpop.f32.mrf.mxu0  ;;  %v1257_v39 = vld [vmem:[#allocation3 + $0x308] sm:$0xff] }
 0x162   : > { %1081 = vst [vmem:[#allocation2 + $0x31] sm:$0xff] %v3736_v56  ;;  %v3739_v2 = vmax.f32 %v1032_v62, 0.0  ;;  %v1027_v47 = vadd.f32 %v1026_v0, %v922_v54  ;;  %v1272_v62 = vld [vmem:[#allocation3 + $0x380] sm:$0xff] }
 0x163   : > { %v2712_v41 = vpop.f32.mrf.mxu0  ;;  %v3748_v9 = vld [vmem:[#allocation2 + $0x20] sm:$0xff] }
 0x164   : > { %1084 = vst [vmem:[#allocation2 + $0x61] sm:$0xff] %v3739_v2  ;;  %v3742_v53 = vmax.f32 %v1027_v47, 0.0  ;;  %v1042_v15 = vadd.f32 %v2712_v41, %v937_v61  ;;  %v3764_v17 = vld [vmem:[#allocation2 + $0x22] sm:$0xff]  ;;  %v3821_v41 = vld [vmem:[%s4194_s3 + $0x70] sm:$0xff] }
 0x165   : > { %v1036_v13 = vpop.f32.mrf.mxu0  ;;  %v1111_v58 = vld [vmem:[#allocation2 + $0x10] sm:$0xff]  ;;  %v1256_v0 = vld [vmem:[#allocation3 + $0x300] sm:$0xff]  ;;  %v1301_v47 = vld [vmem:[#allocation3 + $0x468] sm:$0xff] }
 0x166   : > { %1083 = vst [vmem:[#allocation2 + $0x51] sm:$0xff] %v3742_v53  ;;  %v3745_v33 = vmax.f32 %v1042_v15, 0.0  ;;  %v1037_v59 = vadd.f32 %v1036_v13, %v932_v35  ;;  %1480 = vmatprep.mubr.f32.mxu0 %v1111_v58  ;;  %1381 = vmatmul.mubr.f32.gmra.mxu1 %v1111_v58  ;;  %v3756_v4 = vld [vmem:[#allocation2 + $0x12] sm:$0xff]  ;;  %v1300_v61 = vld [vmem:[#allocation3 + $0x460] sm:$0xff]  ;;  %v1297_v13 = vld [vmem:[#allocation3 + $0x448] sm:$0xff] }
 0x167   : > { %1481 = vmatmul.mubr.f32.vlgmr.msra.gmra.mxu0 %v1103_v11  ;;  %1385 = vmatprep.mubr.f32.mxu1 %v3723_v38  ;;  %v3768_v21 = vld [vmem:[#allocation2 + $0x40] sm:$0xff]  ;;  %v1299_v15 = vld [vmem:[#allocation3 + $0x458] sm:$0xff]  ;;  %v1298_v35 = vld [vmem:[#allocation3 + $0x450] sm:$0xff] }
 0x168   : > { %1086 = vst [vmem:[#allocation2 + $0x81] sm:$0xff] %v3745_v33  ;;  %v3751_v19 = vmax.f32 %v1037_v59, 0.0  ;;  %1485 = vmatprep.mubr.f32.mxu0 %v3748_v9  ;;  %2566 = vmatpush3.msra.mxu0 %v1271_v31  ;;  %v3780_v40 = vld [vmem:[#allocation2 + $0x42] sm:$0xff]  ;;  %v3857_v31 = vld [vmem:[%s4194_s3 + $0x50] sm:$0xff]  ;;  %v1295_v59 = vld [vmem:[#allocation3 + $0x438] sm:$0xff] }
 0x169   : > { %2567 = vmatprep.subr.mxu0 %v1286_v63  ;;  %v3759_v12 = vld [vmem:[#allocation2 + $0x30] sm:$0xff]  ;;  %v3839_v11 = vld [vmem:[%s4194_s3 + $0x60] sm:$0xff] }
 0x16a   : > { %1085 = vst [vmem:[#allocation2 + $0x71] sm:$0xff] %v3751_v19  ;;  %2568 = vmatpush3.msra.mxu0 %v1270_v16  ;;  %1386 = vmatmul.mubr.f32.gmra.mxu1 %v3748_v9  ;;  %v3772_v22 = vld [vmem:[#allocation2 + $0x32] sm:$0xff]  ;;  %v1296_v58 = vld [vmem:[#allocation3 + $0x440] sm:$0xff]  ;;  %v1293_v16 = vld [vmem:[#allocation3 + $0x428] sm:$0xff] }
 0x16b   : > { %1486 = vmatmul.mubr.f32.gmra.mxu0 %v3756_v4  ;;  %2569 = vmatprep.subr.mxu0 %v1285_v3  ;;  %v3784_v34 = vld [vmem:[#allocation2 + $0x60] sm:$0xff]  ;;  %v1294_v63 = vld [vmem:[#allocation3 + $0x430] sm:$0xff] }
 0x16c   : > { %1390 = vmatprep.mubr.f32.mxu1 %v3736_v56  ;;  %1490 = vmatprep.mubr.f32.mxu0 %v3759_v12  ;;  %v3796_v51 = vld [vmem:[#allocation2 + $0x62] sm:$0xff] }
 0x16d   : > { %2570 = vmatpush3.msra.mxu0 %v1269_v10  ;;  %v3776_v25 = vld [vmem:[#allocation2 + $0x50] sm:$0xff]  ;;  %v1292_v3 = vld [vmem:[#allocation3 + $0x420] sm:$0xff]  ;;  %v1291_v10 = vld [vmem:[#allocation3 + $0x418] sm:$0xff] }
 0x16e   : > { %2571 = vmatprep.subr.mxu0 %v1284_v7  ;;  %1391 = vmatmul.mubr.f32.gmra.mxu1 %v3759_v12  ;;  %v3788_v46 = vld [vmem:[#allocation2 + $0x52] sm:$0xff] }
 0x16f   : > { %2572 = vmatpush3.msra.mxu0 %v1268_v29  ;;  %1395 = vmatprep.mubr.f32.mxu1 %v3731_v32  ;;  %v3800_v55 = vld [vmem:[#allocation2 + $0x80] sm:$0xff] }
 0x170   : > { %1491 = vmatmul.mubr.f32.gmra.mxu0 %v3764_v17  ;;  %2573 = vmatprep.subr.mxu0 %v1283_v1  ;;  %v1134_v7 = vld [vmem:[#allocation2 + $0x82] sm:$0xff] }
 0x171   : > { %1495 = vmatprep.mubr.f32.mxu0 %v3768_v21  ;;  %2574 = vmatpush3.msra.mxu0 %v1267_v14  ;;  %v3792_v49 = vld [vmem:[#allocation2 + $0x70] sm:$0xff]  ;;  %v3911_v29 = vld [vmem:[%s4194_s3 + $0x20] sm:$0xff]  ;;  %v1289_v1 = vld [vmem:[#allocation3 + $0x408] sm:$0xff] }
 0x172   : > { %2575 = vmatprep.subr.mxu0 %v1282_v18  ;;  %1396 = vmatmul.mubr.f32.gmra.mxu1 %v3768_v21  ;;  %v3804_v54 = vld [vmem:[#allocation2 + $0x72] sm:$0xff]  ;;  %v1288_v14 = vld [vmem:[#allocation3 + $0x400] sm:$0xff] }
 0x173   : > { %2576 = vmatpush3.msra.mxu0 %v1266_v5  ;;  %1400 = vmatprep.mubr.f32.mxu1 %v3742_v53  ;;  %v1838_v18 = vld [vmem:[%s4194_s3 + $0x10] sm:$0xff] }
 0x174   : > { %1496 = vmatmul.mubr.f32.gmra.mxu0 %v3772_v22  ;;  %2577 = vmatprep.subr.mxu0 %v1281_v50  ;;  %v1143_v5 = vld [vmem:[#allocation2 + $0x90] sm:$0xff] }
 0x175   : > { %1500 = vmatprep.mubr.f32.mxu0 %v3776_v25  ;;  %2578 = vmatpush3.msra.mxu0 %v1265_v6  ;;  %v2889_v50 = vld [vmem:[%s3277_s8 + $0x1b0] sm:$0xff]  ;;  %v2890_v6 = vld [vmem:[%s3277_s8 + $0x1c0] sm:$0xff] }
 0x176   : > { %2579 = vmatprep.subr.mxu0 %v1280_v24  ;;  %1401 = vmatmul.mubr.f32.gmra.mxu1 %v3776_v25  ;;  %v2892_v24 = vld [vmem:[%s3277_s8 + $0x1e0] sm:$0xff] }
 0x177   : > { %2580 = vmatpush3.msra.mxu0 %v1264_v26  ;;  %1405 = vmatprep.mubr.f32.mxu1 %v3739_v2  ;;  %v2893_v26 = vld [vmem:[%s3277_s8 + $0x1f0] sm:$0xff] }
 0x178   : > { %1501 = vmatmul.mubr.f32.gmra.mxu0 %v3780_v40  ;;  %2581 = vmatprep.subr.mxu0 %v1279_v27  ;;  %v2894_v27 = vld [vmem:[%s3277_s8 + $0x200] sm:$0xff] }
 0x179   : > { %1505 = vmatprep.mubr.f32.mxu0 %v3784_v34  ;;  %2582 = vmatpush3.msra.mxu0 %v1263_v30  ;;  %v2895_v30 = vld [vmem:[%s3277_s8 + $0x210] sm:$0xff] }
 0x17a   : > { %2583 = vmatprep.subr.mxu0 %v1278_v28  ;;  %1406 = vmatmul.mubr.f32.gmra.mxu1 %v3784_v34  ;;  %v3975_v28 = vpop.f32.mrf.mxu1 }
 0x17b   : > { %2584 = vmatpush3.msra.mxu0 %v1262_v42  ;;  %1410 = vmatprep.mubr.f32.mxu1 %v3751_v19 }
 0x17c   : > { %1506 = vmatmul.mubr.f32.gmra.mxu0 %v3788_v46  ;;  %2585 = vmatprep.subr.mxu0 %v1277_v43 }
 0x17d   : > { %1510 = vmatprep.mubr.f32.mxu0 %v3792_v49  ;;  %2586 = vmatpush3.msra.mxu0 %v1261_v45 }
 0x17e   : > { %2587 = vmatprep.subr.mxu0 %v1276_v48  ;;  %1411 = vmatmul.mubr.f32.gmra.mxu1 %v3792_v49 }
 0x17f   : > { %2588 = vmatpush3.msra.mxu0 %v1260_v8  ;;  %1585 = vmatprep.mubr.f32.mxu1 %v3756_v4  ;;  %v3893_v4 = vld [vmem:[%s4194_s3 + $0x30] sm:$0xff] }
 0x180   : > { %1511 = vmatmul.mubr.f32.gmra.mxu0 %v3796_v51  ;;  %2589 = vmatprep.subr.mxu0 %v1275_v36 }
 0x181   : > { %1515 = vmatprep.mubr.f32.mxu0 %v3800_v55  ;;  %2590 = vmatpush3.msra.mxu0 %v1259_v20 }
 0x182   : > { %2591 = vmatprep.subr.mxu0 %v1274_v23  ;;  %1586 = vmatmul.mubr.f32.vlgmr.msra.gmra.mxu1 %v3728_v37  ;;  %v3813_v37 = vld [vmem:[%s4194_s3 + $0x78] sm:$0xff] }
 0x183   : > { %2592 = vmatpush3.msra.mxu0 %v1258_v52  ;;  %2714 = vmatpush3.msra.mxu1 %v4218_v44 }
 0x184   : > { %1516 = vmatmul.mubr.f32.gmra.mxu0 %v3804_v54  ;;  %2593 = vmatprep.subr.mxu0 %v1273_v57 }
 0x185   : > { %1590 = vmatprep.mubr.f32.mxu1 %v3764_v17  ;;  %2594 = vmatpush3.msra.mxu0 %v1257_v39 }
 0x186   : > { %1690 = vmatprep.mubr.f32.mxu0 %v3723_v38  ;;  %2715 = vmatprep.subr.mxu1 %v1302_v60 }
 0x187   : > { %2595 = vmatprep.subr.mxu0 %v1272_v62  ;;  %2716 = vmatpush3.msra.mxu1 %v1302_v60 }
 0x188   : > { %2596 = vmatpush3.msra.mxu0 %v1256_v0  ;;  %2717 = vmatprep.subr.mxu1 %v1301_v47 }
 0x189   : > { %1591 = vmatmul.mubr.f32.gmra.mxu1 %v3723_v38  ;;  %1691 = vmatmul.mubr.f32.vlgmr.msra.gmra.mxu0 %v3748_v9  ;;  %v3830_v38 = vld [vmem:[%s4194_s3 + $0x68] sm:$0xff]  ;;  %v3875_v9 = vld [vmem:[%s4194_s3 + $0x40] sm:$0xff] }
 0x18a   : > { %2718 = vmatpush3.msra.mxu1 %v1301_v47  ;;  %2757 = vmatprep.subr.mxu0 %v3813_v37  ;;  %v4014_v47 = vld [vmem:[%s4196_s5] ss:$0 sm:$0xff] }
 0x18b   : > { %1595 = vmatprep.mubr.f32.mxu1 %v3772_v22  ;;  %1695 = vmatprep.mubr.f32.mxu0 %v3736_v56 }
 0x18c   : > { %2719 = vmatprep.subr.mxu1 %v1300_v61  ;;  %2758 = vmatpush3.msra.mxu0 %v3813_v37 }
 0x18d   : > { %2720 = vmatpush3.msra.mxu1 %v1300_v61  ;;  %2759 = vmatprep.subr.mxu0 %v3821_v41 }
 0x18e   : > { %2721 = vmatprep.subr.mxu1 %v1299_v15  ;;  %2760 = vmatpush3.msra.mxu0 %v3821_v41 }
 0x18f   : > { %1596 = vmatmul.mubr.f32.gmra.mxu1 %v3736_v56  ;;  %1696 = vmatmul.mubr.f32.gmra.mxu0 %v3759_v12  ;;  %v3848_v56 = vld [vmem:[%s4194_s3 + $0x58] sm:$0xff]  ;;  %v1290_v12 = vld [vmem:[#allocation3 + $0x410] sm:$0xff] }
 0x190   : > { %2722 = vmatpush3.msra.mxu1 %v1299_v15  ;;  %2761 = vmatprep.subr.mxu0 %v3830_v38 }
 0x191   : > { %1600 = vmatprep.mubr.f32.mxu1 %v3780_v40  ;;  %1700 = vmatprep.mubr.f32.mxu0 %v3731_v32 }
 0x192   : > { %2723 = vmatprep.subr.mxu1 %v1298_v35  ;;  %2762 = vmatpush3.msra.mxu0 %v3830_v38 }
 0x193   : > { %2724 = vmatpush3.msra.mxu1 %v1298_v35  ;;  %2763 = vmatprep.subr.mxu0 %v3839_v11 }
 0x194   : > { %2725 = vmatprep.subr.mxu1 %v1297_v13  ;;  %2764 = vmatpush3.msra.mxu0 %v3839_v11 }
 0x195   : > { %1601 = vmatmul.mubr.f32.gmra.mxu1 %v3731_v32  ;;  %1701 = vmatmul.mubr.f32.gmra.mxu0 %v3768_v21  ;;  %v3866_v32 = vld [vmem:[%s4194_s3 + $0x48] sm:$0xff]  ;;  %v1151_v21 = vld [vmem:[#allocation2 + $0x91] sm:$0xff] }
 0x196   : > { %2726 = vmatpush3.msra.mxu1 %v1297_v13  ;;  %2765 = vmatprep.subr.mxu0 %v3848_v56 }
 0x197   : > { %1605 = vmatprep.mubr.f32.mxu1 %v3788_v46  ;;  %1705 = vmatprep.mubr.f32.mxu0 %v3742_v53 }
 0x198   : > { %2727 = vmatprep.subr.mxu1 %v1296_v58  ;;  %2766 = vmatpush3.msra.mxu0 %v3848_v56 }
 0x199   : > { %2728 = vmatpush3.msra.mxu1 %v1296_v58  ;;  %2767 = vmatprep.subr.mxu0 %v3857_v31 }
 0x19a   : > { %2729 = vmatprep.subr.mxu1 %v1295_v59  ;;  %2768 = vmatpush3.msra.mxu0 %v3857_v31 }
 0x19b   : > { %1606 = vmatmul.mubr.f32.gmra.mxu1 %v3742_v53  ;;  %1706 = vmatmul.mubr.f32.gmra.mxu0 %v3776_v25  ;;  %v3884_v53 = vld [vmem:[%s4194_s3 + $0x38] sm:$0xff] }
 0x19c   : > { %2730 = vmatpush3.msra.mxu1 %v1295_v59  ;;  %2769 = vmatprep.subr.mxu0 %v3866_v32  ;;  %v1159_v25 = vld [vmem:[#allocation2 + $0x92] sm:$0xff] }
 0x19d   : > { %1610 = vmatprep.mubr.f32.mxu1 %v3796_v51  ;;  %1710 = vmatprep.mubr.f32.mxu0 %v3739_v2 }
 0x19e   : > { %2731 = vmatprep.subr.mxu1 %v1294_v63  ;;  %2770 = vmatpush3.msra.mxu0 %v3866_v32 }
 0x19f   : > { %2732 = vmatpush3.msra.mxu1 %v1294_v63  ;;  %2771 = vmatprep.subr.mxu0 %v3875_v9 }
 0x1a0   : > { %2733 = vmatprep.subr.mxu1 %v1293_v16  ;;  %2772 = vmatpush3.msra.mxu0 %v3875_v9 }
 0x1a1   : > { %1611 = vmatmul.mubr.f32.gmra.mxu1 %v3739_v2  ;;  %1711 = vmatmul.mubr.f32.gmra.mxu0 %v3784_v34  ;;  %v3902_v2 = vld [vmem:[%s4194_s3 + $0x28] sm:$0xff]  ;;  %v3977_v34 = vpop.f32.mrf.mxu1 }
 0x1a2   : > { %2734 = vmatpush3.msra.mxu1 %v1293_v16  ;;  %2773 = vmatprep.subr.mxu0 %v3884_v53 }
 0x1a3   : > { %1615 = vmatprep.mubr.f32.mxu1 %v3804_v54  ;;  %1715 = vmatprep.mubr.f32.mxu0 %v3751_v19 }
 0x1a4   : > { %2735 = vmatprep.subr.mxu1 %v1292_v3  ;;  %2774 = vmatpush3.msra.mxu0 %v3884_v53 }
 0x1a5   : > { %2736 = vmatpush3.msra.mxu1 %v1292_v3  ;;  %2775 = vmatprep.subr.mxu0 %v3893_v4 }
 0x1a6   : > { %2737 = vmatprep.subr.mxu1 %v1291_v10  ;;  %2776 = vmatpush3.msra.mxu0 %v3893_v4 }
 0x1a7   : > { %1616 = vmatmul.mubr.f32.gmra.mxu1 %v3751_v19  ;;  %1716 = vmatmul.mubr.f32.gmra.mxu0 %v3792_v49  ;;  %v3919_v19 = vld [vmem:[%s4194_s3 + $0x18] sm:$0xff] }
 0x1a8   : > { %2738 = vmatpush3.msra.mxu1 %v1291_v10  ;;  %2777 = vmatprep.subr.mxu0 %v3902_v2 }
 0x1a9   : > { %1620 = vmatprep.mubr.f32.mxu1 %v1134_v7  ;;  %1720 = vmatprep.mubr.f32.mxu0 %v3745_v33 }
 0x1aa   : > { %2739 = vmatprep.subr.mxu1 %v1290_v12  ;;  %2778 = vmatpush3.msra.mxu0 %v3902_v2 }
 0x1ab   : > { %2740 = vmatpush3.msra.mxu1 %v1290_v12  ;;  %2779 = vmatprep.subr.mxu0 %v3911_v29 }
 0x1ac   : > { %2741 = vmatprep.subr.mxu1 %v1289_v1  ;;  %2780 = vmatpush3.msra.mxu0 %v3911_v29 }
 0x1ad   : > { %1621 = vmatmul.mubr.f32.gmra.mxu1 %v3745_v33  ;;  %1721 = vmatmul.mubr.f32.gmra.mxu0 %v3800_v55  ;;  %v1837_v33 = vld [vmem:[%s4194_s3 + $0x8] sm:$0xff] }
 0x1ae   : > { %2742 = vmatpush3.msra.mxu1 %v1289_v1  ;;  %2781 = vmatprep.subr.mxu0 %v3919_v19 }
 0x1af   : > { %2743 = vmatprep.subr.mxu1 %v1288_v14  ;;  %2745 = vmatprep.mubr.f32.mxu1 %v3764_v17  ;;  %v1836_v17 = vld [vmem:[%s4194_s3] sm:$0xff] }
 0x1b0   : > { %2782 = vmatpush3.msra.mxu0 %v3919_v19  ;;  %2744 = vmatpush3.msra.mxu1 %v1288_v14 }
 0x1b1   : > { %2783 = vmatprep.subr.mxu0 %v1838_v18  ;;  %1725 = vmatprep.mubr.f32.mxu0 %v1151_v21 }
 0x1b2   : > { %2801 = vmatprep.subr.mxu1 %v3813_v37  ;;  %2784 = vmatpush3.msra.mxu0 %v1838_v18 }
 0x1b3   : > { %1726 = vmatmul.mubr.f32.gmra.mxu0 %v1143_v5  ;;  %2746 = vmatmul.mubr.f32.vlgmr.msra.gmra.mxu1 %v3772_v22  ;;  %v2891_v22 = vld [vmem:[%s3277_s8 + $0x1d0] sm:$0xff] }
 0x1b4   : > { %2817 = vmatpush3.msra.mxu1 %v3813_v37  ;;  %2785 = vmatprep.subr.mxu0 %v1837_v33 }
 0x1b5   : > { %2748 = vmatprep.mubr.f32.mxu1 %v3780_v40  ;;  %2802 = vmatprep.subr.mxu1 %v3821_v41  ;;  %v2896_v40 = vld [vmem:[%s3277_s8 + $0x220] sm:$0xff]  ;;  %s2927_s8 = sshll.u32 %s2993_s14, 4  ;;  %s2928_s8 = int_to_ptr.vmem [resolvable:$false] %s2927_s8 }
 0x1b6   : > { %2786 = vmatpush3.msra.mxu0 %v1837_v33  ;;  %2818 = vmatpush3.msra.mxu1 %v3821_v41  ;;  %s2929_s16 = scalar_lea.vmem %s2928_s8, 2048  ;;  %p2930_p11 = scmp.lt.s32.totalorder %s4140_s22, %s2928_s8 }
 0x1b7   : > { %2787 = vmatprep.subr.mxu0 %v1836_v17  ;;  %2803 = vmatprep.subr.mxu1 %v3830_v38  ;;  %p2931_p12 = scmp.lt.s32.totalorder %s2929_s16, %s2923_s28 }
 0x1b8   : > { %2788 = vmatpush3.msra.mxu0 %v1836_v17  ;;  %2789 = vmatprep.mubr.f32.mxu0 %v2889_v50 }
 0x1b9   : > { %2749 = vmatmul.mubr.f32.gmra.mxu1 %v3788_v46  ;;  %2790 = vmatmul.mubr.f32.vlgmr.msra.gmra.mxu0 %v2890_v6  ;;  %p2932_p13 = por %p2931_p12, %p2930_p11 }
 0x1ba   : > { %2819 = vmatpush3.msra.mxu1 %v3830_v38  ;;  %2751 = vmatprep.mubr.f32.mxu1 %v3796_v51 }
 0x1bb   : > { %2804 = vmatprep.subr.mxu1 %v3839_v11  ;;  %2792 = vmatprep.mubr.f32.mxu0 %v2891_v22  ;;  %p2933_p0 = pnand %p2932_p13, %p2926_p10 }
 0x1bc   : > { %2820 = vmatpush3.msra.mxu1 %v3839_v11 }
 0x1bd   : > { %2805 = vmatprep.subr.mxu1 %v3848_v56  ;;  %2752 = vmatmul.mubr.f32.gmra.mxu1 %v3804_v54 }
 0x1be   : > { %2821 = vmatpush3.msra.mxu1 %v3848_v56  ;;  %2793 = vmatmul.mubr.f32.gmra.mxu0 %v2892_v24 }
 0x1bf   : > { %2754 = vmatprep.mubr.f32.mxu1 %v1134_v7  ;;  %2806 = vmatprep.subr.mxu1 %v3857_v31 }
 0x1c0   : > { %2822 = vmatpush3.msra.mxu1 %v3857_v31 }
 0x1c1   : > { %2807 = vmatprep.subr.mxu1 %v3866_v32  ;;  %2755 = vmatmul.mubr.f32.gmra.mxu1 %v1159_v25 }
 0x1c2   : > { %2823 = vmatpush3.msra.mxu1 %v3866_v32  ;;  %2795 = vmatprep.mubr.f32.mxu1 %v2893_v26 }
 0x1c3   : > { %2808 = vmatprep.subr.mxu1 %v3875_v9 }
 0x1c4   : > { %2824 = vmatpush3.msra.mxu1 %v3875_v9 }
 0x1c5   : > { %2809 = vmatprep.subr.mxu1 %v3884_v53 }
 0x1c6   : > { %2825 = vmatpush3.msra.mxu1 %v3884_v53 }
 0x1c7   : > { %2810 = vmatprep.subr.mxu1 %v3893_v4 }
 0x1c8   : > { %2826 = vmatpush3.msra.mxu1 %v3893_v4 }
 0x1c9   : > { %2811 = vmatprep.subr.mxu1 %v3902_v2 }
 0x1ca   : > { %2827 = vmatpush3.msra.mxu1 %v3902_v2 }
 0x1cb   : > { %2812 = vmatprep.subr.mxu1 %v3911_v29 }
 0x1cc   : > { %2828 = vmatpush3.msra.mxu1 %v3911_v29 }
 0x1cd   : > { %2813 = vmatprep.subr.mxu1 %v3919_v19 }
 0x1ce   : > { %2829 = vmatpush3.msra.mxu1 %v3919_v19 }
 0x1cf   : > { %2814 = vmatprep.subr.mxu1 %v1838_v18 }
 0x1d0   : > { %2830 = vmatpush3.msra.mxu1 %v1838_v18 }
 0x1d1   : > { %2815 = vmatprep.subr.mxu1 %v1837_v33 }
 0x1d2   : > { %2831 = vmatpush3.msra.mxu1 %v1837_v33 }
 0x1d3   : > { %2816 = vmatprep.subr.mxu1 %v1836_v17 }
 0x1d4   : > { %2832 = vmatpush3.msra.mxu1 %v1836_v17 }
 0x1d5   : > { %2796 = vmatmul.mubr.f32.vlgmr.msra.gmra.mxu1 %v2894_v27 }
 0x1d6   : > { %2798 = vmatprep.mubr.f32.mxu1 %v2895_v30 }
 0x1d9   : > { %2799 = vmatmul.mubr.f32.gmra.mxu1 %v2896_v40 }
 0x226   : > { %v3979_v42 = vpop.f32.mrf.mxu1 }
 0x227   : > { %v3981_v43 = vpop.f32.mrf.mxu0 }
 0x228   : > { %v3983_v45 = vpop.f32.mrf.mxu1 }
 0x229   : > { %v3985_v46 = vpop.f32.mrf.mxu0 }
 0x22a   : > { %v3987_v48 = vpop.f32.mrf.mxu1 }
 0x22b   : > { %v3989_v49 = vpop.f32.mrf.mxu0 }
 0x22c   : > { %v3991_v8 = vpop.f32.mrf.mxu1 }
 0x22d   : > { %v3993_v36 = vpop.f32.mrf.mxu0 }
 0x22e   : > { %v3995_v20 = vpop.f32.mrf.mxu1 }
 0x230   : > { %v3997_v51 = vpop.f32.mrf.mxu0  ;;  %v3999_v23 = vpop.f32.mrf.mxu1 }
 0x232   : > { %v4001_v55 = vpop.f32.mrf.mxu0  ;;  %v2441_v52 = vpop.f32.mrf.mxu1 }
 0x234   : > { %v4003_v57 = vpop.f32.mrf.mxu0  ;;  %v2442_v39 = vpop.f32.mrf.mxu1 }
 0x235   : > { %v2443_v54 = vadd.f32 %v2442_v39, %v2441_v52 }
 0x236   : > { %v4005_v44 = vpop.f32.mrf.mxu0  ;;  %v4007_v60 = vpop.f32.mrf.mxu1 }
 0x237   : > { %v1398_v41 = vadd.f32 %v2443_v54, %v4014_v47 }
 0x238   : > { %v2497_v62 = vpop.f32.mrf.mxu0  ;;  %v4009_v0 = vpop.f32.mrf.mxu1 }
 0x23a   : > { %v2498_v37 = vpop.f32.mrf.mxu0  ;;  %v2447_v61 = vpop.f32.mrf.mxu1 }
 0x23b   : > { %v2499_v15 = vadd.f32 %v2498_v37, %v2497_v62 }
 0x23c   : > { %v4017_v38 = vpop.f32.mrf.mxu0  ;;  %v2448_v35 = vpop.f32.mrf.mxu1 }
 0x23d   : > { %v4019_v11 = vadd.f32 %v2499_v15, %v1398_v41  ;;  %v2449_v58 = vadd.f32 %v2448_v35, %v2447_v61  ;;  %v2434_v61 = vadd.f32 %v3983_v45, %v3979_v42  ;;  %v2431_v35 = vadd.f32 %v3977_v34, %v3975_v28 }
 0x23e   : > { %v4021_v13 = vpop.f32.mrf.mxu0  ;;  %v4023_v56 = vpop.f32.mrf.mxu1 }
 0x23f   : > { %v1408_v9 = vadd.f32 %v2449_v58, %v4014_v47  ;;  %v2490_v58 = vadd.f32 %v3993_v36, %v3989_v49  ;;  %v2437_v49 = vadd.f32 %v3991_v8, %v3987_v48  ;;  %v2496_v36 = vadd.f32 %v4005_v44, %v4003_v57  ;;  %v4089_v48 = vld [vmem:[%s4197_s6] ss:$0 sm:$0xff] }
 0x240   : > { %v2503_v31 = vpop.f32.mrf.mxu0  ;;  %v4025_v59 = vpop.f32.mrf.mxu1 }
 0x241   : > { %v1388_v44 = vadd.f32 %v2437_v49, %v4014_v47 }
 0x242   : > { %v2504_v32 = vpop.f32.mrf.mxu0  ;;  %v2541_v63 = vpop.f32.mrf.mxu1 }
 0x243   : > { %v2505_v16 = vadd.f32 %v2504_v32, %v2503_v31  ;;  %v1383_v31 = vadd.f32 %v2434_v61, %v4014_v47  ;;  %v2487_v32 = vadd.f32 %v3985_v46, %v3981_v43  ;;  %v2493_v61 = vadd.f32 %v4001_v55, %v3997_v51 }
 0x244   : > { %v4028_v53 = vpop.f32.mrf.mxu0  ;;  %v2542_v4 = vpop.f32.mrf.mxu1 }
 0x245   : > { %v4030_v3 = vadd.f32 %v2505_v16, %v1408_v9  ;;  %v2440_v16 = vadd.f32 %v3999_v23, %v3995_v20  ;;  %v2543_v28 = vadd.f32 %v2542_v4, %v2541_v63  ;;  %v1493_v55 = vadd.f32 %v2493_v61, %v1388_v44 }
 0x246   : > { %v4032_v10 = vpop.f32.mrf.mxu0  ;;  %v2446_v61 = vadd.f32 %v4009_v0, %v4007_v60  ;;  %v2452_v44 = vadd.f32 %v4025_v59, %v4023_v56 }
 0x247   : > { %4219 = vst [vmem:[#allocation12_spill] sm:$0xff] %v4030_v3  ;;  %v1378_v3 = vadd.f32 %v2431_v35, %v4014_v47 }
 0x249   : > { %v2544_v2 = vpop.f32.mrf.mxu1  ;;  %v2597_v12 = vpop.f32.mrf.mxu0  ;;  %v1483_v46 = vadd.f32 %v2487_v32, %v1378_v3 }
 0x24b   : > { %v2545_v7 = vpop.f32.mrf.mxu1  ;;  %v2598_v29 = vpop.f32.mrf.mxu0  ;;  %v1588_v8 = vadd.f32 %v2543_v28, %v1483_v46 }
 0x24c   : > { %v2546_v9 = vadd.f32 %v2545_v7, %v2544_v2  ;;  %v2599_v20 = vadd.f32 %v2598_v29, %v2597_v12  ;;  %v1393_v7 = vadd.f32 %v2440_v16, %v4014_v47 }
 0x24e   : > { %v1498_v3 = vadd.f32 %v2496_v36, %v1393_v7 }
 0x24f   : > { %v2547_v1 = vpop.f32.mrf.mxu1  ;;  %v2600_v19 = vpop.f32.mrf.mxu0 }
 0x251   : > { %v2548_v14 = vpop.f32.mrf.mxu1  ;;  %v2601_v18 = vpop.f32.mrf.mxu0 }
 0x252   : > { %v2602_v34 = vadd.f32 %v2601_v18, %v2600_v19  ;;  %v2549_v4 = vadd.f32 %v2548_v14, %v2547_v1  ;;  %v1693_v18 = vadd.f32 %v2599_v20, %v1588_v8  ;;  %v2502_v8 = vadd.f32 %v4021_v13, %v4017_v38 }
 0x253   : > { %v1413_v38 = vadd.f32 %v2452_v44, %v4014_v47 }
 0x255   : > { %v2550_v21 = vpop.f32.mrf.mxu1  ;;  %v2603_v5 = vpop.f32.mrf.mxu0 }
 0x257   : > { %v2551_v33 = vpop.f32.mrf.mxu1  ;;  %v2604_v17 = vpop.f32.mrf.mxu0 }
 0x258   : > { %v2552_v63 = vadd.f32 %v2551_v33, %v2550_v21  ;;  %v2605_v33 = vadd.f32 %v2604_v17, %v2603_v5 }
 0x25a   : > { %v1603_v21 = vadd.f32 %v2552_v63, %v1498_v3 }
 0x25b   : > { %v4034_v50 = vpop.f32.mrf.mxu1  ;;  %v2606_v6 = vpop.f32.mrf.mxu0 }
 0x25d   : > { %v4036_v22 = vpop.f32.mrf.mxu1  ;;  %v2607_v24 = vpop.f32.mrf.mxu0 }
 0x25e   : > { %v2608_v12 = vadd.f32 %v2607_v24, %v2606_v6  ;;  %v2555_v60 = vadd.f32 %v4036_v22, %v4034_v50 }
 0x260   : > { %v1708_v16 = vadd.f32 %v2608_v12, %v1603_v21 }
 0x261   : > { %v4038_v25 = vpop.f32.mrf.mxu1  ;;  %v4040_v26 = vpop.f32.mrf.mxu0 }
 0x263   : > { %v4042_v27 = vpop.f32.mrf.mxu1  ;;  %v4044_v30 = vpop.f32.mrf.mxu0 }
 0x264   : > { %v2558_v3 = vadd.f32 %v4042_v27, %v4038_v25  ;;  %v2611_v56 = vadd.f32 %v4044_v30, %v4040_v26 }
 0x267   : > { %v4046_v40 = vpop.f32.mrf.mxu1  ;;  %v4048_v52 = vpop.f32.mrf.mxu0 }
 0x269   : > { %v4050_v39 = vpop.f32.mrf.mxu1  ;;  %v4052_v54 = vpop.f32.mrf.mxu0 }
 0x26a   : > { %v2614_v0 = vadd.f32 %v4052_v54, %v4048_v52  ;;  %v2561_v25 = vadd.f32 %v4050_v39, %v4046_v40 }
 0x26d   : > { %v4054_v62 = vpop.f32.mrf.mxu1  ;;  %v4056_v37 = vpop.f32.mrf.mxu0 }
 0x26f   : > { %v4060_v41 = vpop.f32.mrf.mxu1  ;;  %v4062_v15 = vpop.f32.mrf.mxu0 }
 0x270   : > { %4220 = vst [vmem:[#allocation13_spill] sm:$0xff] %v4062_v15  ;;  %v1488_v15 = vadd.f32 %v2490_v58, %v1383_v31  ;;  %v2564_v59 = vadd.f32 %v4060_v41, %v4054_v62  ;;  %v4222_v41 = vld [vmem:[#allocation12_spill] sm:$0xff] }
 0x271   : > { %v1618_v40 = vadd.f32 %v2561_v25, %v4222_v41 }
 0x272   : > { %v1593_v2 = vadd.f32 %v2546_v9, %v1488_v15  ;;  %v1598_v9 = vadd.f32 %v2549_v4, %v1493_v55 }
 0x273   : > { %v4073_v42 = vpop.f32.mrf.mxu0  ;;  %v2747_v45 = vpop.f32.mrf.mxu1 }
 0x274   : > { %v1698_v57 = vadd.f32 %v2602_v34, %v1593_v2  ;;  %v1703_v28 = vadd.f32 %v2605_v33, %v1598_v9 }
 0x275   : > { %v4080_v43 = vpop.f32.mrf.mxu0  ;;  %v1797_v23 = vpop.f32.mrf.mxu1 }
 0x276   : > { %v1803_v19 = vadd.f32 %v2747_v45, %v1698_v57  ;;  %v1798_v58 = vadd.f32 %v1797_v23, %v1693_v18  ;;  %v1403_v57 = vadd.f32 %v2446_v61, %v4014_v47  ;;  %v2620_v50 = vadd.f32 %v4080_v43, %v4073_v42 }
 0x277   : > { %v4221_v47 = vld [vmem:[#allocation13_spill] sm:$0xff] }
 0x278   : > { %v1508_v12 = vadd.f32 %v2502_v8, %v1403_v57  ;;  %v2617_v52 = vadd.f32 %v4221_v47, %v4056_v37 }
 0x279   : > { %v2791_v29 = vpop.f32.mrf.mxu0  ;;  %v2750_v15 = vpop.f32.mrf.mxu1 }
 0x27a   : > { %v1931_v51 = vadd.f32 %v2791_v29, %v4089_v48  ;;  %v1813_v45 = vadd.f32 %v2750_v15, %v1708_v16  ;;  %v2508_v29 = vadd.f32 %v4032_v10, %v4028_v53  ;;  %v1613_v13 = vadd.f32 %v2558_v3, %v1508_v12 }
 0x27b   : > { %v1925_v35 = vpop.f32.mrf.mxu0  ;;  %v1807_v14 = vpop.f32.mrf.mxu1  ;;  %v1608_v10 = vadd.f32 %v2555_v60, %v4019_v11  ;;  %v1723_v43 = vadd.f32 %v2617_v52, %v1618_v40 }
 0x27c   : > { %v1965_v31 = vadd.f32 %v1931_v51, %v1803_v19  ;;  %v1926_v32 = vadd.f32 %v4089_v48, %v1925_v35  ;;  %v1808_v49 = vadd.f32 %v1807_v14, %v1703_v28  ;;  %v1518_v53 = vadd.f32 %v2508_v29, %v1413_v38 }
 0x27d   : > { %v2753_v7 = vpop.f32.mrf.mxu1  ;;  %v1718_v22 = vadd.f32 %v2614_v0, %v1613_v13  ;;  %v1713_v30 = vadd.f32 %v2611_v56, %v1608_v10 }
 0x27e   : > { %v1973_v1 = vmax.f32 %v1965_v31, 0.0  ;;  %v1964_v6 = vadd.f32 %v1926_v32, %v1798_v58  ;;  %v2794_v24 = vpop.f32.mrf.mxu0  ;;  %v1623_v19 = vadd.f32 %v2564_v59, %v1518_v53 }
 0x27f   : > { %v1941_v34 = vadd.f32 %v2794_v24, %v4089_v48  ;;  %v1817_v63 = vpop.f32.mrf.mxu1  ;;  %v1823_v26 = vadd.f32 %v2753_v7, %v1718_v22 }
 0x280   : > { %1981 = vst [vmem:[%s4097_s21 + $0x8] sm:$0xff] %v1973_v1  ;;  %v1972_v5 = vmax.f32 %v1964_v6, 0.0  ;;  %v1935_v17 = vpop.f32.mrf.mxu0  ;;  %v1818_v18 = vadd.f32 %v1817_v63, %v1713_v30  ;;  %v1728_v11 = vadd.f32 %v2620_v50, %v1623_v19 }
 0x281   : > { %v1967_v36 = vadd.f32 %v1941_v34, %v1813_v45  ;;  %v1936_v46 = vadd.f32 %v4089_v48, %v1935_v17  ;;  %v2756_v4 = vpop.f32.mrf.mxu1 }
 0x282   : > { %1980 = vst [vmem:[%s4097_s21] sm:$0xff] %v1972_v5  ;;  %v1833_v51 = vadd.f32 %v2756_v4, %v1728_v11 }
 0x283   : > { %v1975_v2 = vmax.f32 %v1967_v36, 0.0  ;;  %v1966_v20 = vadd.f32 %v1936_v46, %v1808_v49  ;;  %v1827_v27 = vpop.f32.mrf.mxu1 }
 0x284   : > { %v1828_v58 = vadd.f32 %v1827_v27, %v1723_v43 }
 0x285   : > { %1983 = vst [vmem:[%s4097_s21 + $0x18] sm:$0xff] %v1975_v2  ;;  %v1974_v23 = vmax.f32 %v1966_v20, 0.0 }
 0x287   : > { %1982 = vst [vmem:[%s4097_s21 + $0x10] sm:$0xff] %v1974_v23 }
 0x295   : > { %v2797_v54 = vpop.f32.mrf.mxu1 }
 0x296   : > { %v1951_v62 = vadd.f32 %v2797_v54, %v4089_v48 }
 0x297   : > { %v1945_v39 = vpop.f32.mrf.mxu1 }
 0x298   : > { %v1969_v15 = vadd.f32 %v1951_v62, %v1823_v26  ;;  %v1946_v42 = vadd.f32 %v4089_v48, %v1945_v39 }
 0x299   : > { %v2800_v37 = vpop.f32.mrf.mxu1 }
 0x29a   : > { %v1977_v55 = vmax.f32 %v1969_v15, 0.0  ;;  %v1968_v21 = vadd.f32 %v1946_v42, %v1818_v18  ;;  %v1961_v33 = vadd.f32 %v2800_v37, %v4089_v48 }
 0x29b   : > { %v1955_v35 = vpop.f32.mrf.mxu1 }
 0x29c   : > { %1985 = vst [vmem:[%s4097_s21 + $0x28] sm:$0xff] %v1977_v55  ;;  %v1976_v31 = vmax.f32 %v1968_v21, 0.0  ;;  %v1971_v32 = vadd.f32 %v1961_v33, %v1833_v51  ;;  %v1956_v9 = vadd.f32 %v4089_v48, %v1955_v35 }
 0x29e   : > { %1984 = vst [vmem:[%s4097_s21 + $0x20] sm:$0xff] %v1976_v31  ;;  %v1979_v16 = vmax.f32 %v1971_v32, 0.0  ;;  %v1970_v1 = vadd.f32 %v1956_v9, %v1828_v58 }
 0x2a0   : > { %1987 = vst [vmem:[%s4097_s21 + $0x38] sm:$0xff] %v1979_v16  ;;  %v1978_v14 = vmax.f32 %v1970_v1, 0.0 }
 0x2a2   : > { %1986 = vst [vmem:[%s4097_s21 + $0x30] sm:$0xff] %v1978_v14 }
 0x2a3   : > { %2936 = shalt.err (!%p2933_p0)
}
 0x2a4   : > { %s2937_s17 = scalar_lea.hbm %s4145_s13, 1024  ;;  %s2941_s20 = scalar_lea.hbm %s4198_s7, 2048 }
 0x2a5   : > { %p2938_p1 = scmp.ne.s32.totalorder %s4145_s13, %s2937_s17  ;;  %p2942_p4 = scmp.lt.s32.totalorder %s4145_s13, %s4198_s7 }
 0x2a6   : > { %p2943_p7 = scmp.lt.s32.totalorder %s2941_s20, %s2937_s17 }
 0x2a7   : > { %p2939_p2 = pnand %p2938_p1, %p3074_p5 }
 0x2a8   : > { %p2944_p6 = por %p2943_p7, %p2942_p4 }
 0x2a9   : > { %p2940_p3 = pneg %p2939_p2 }
 0x2ab   : > { %p2945_p8 = pnand %p2944_p6, %p2940_p3 }
 0x2ad   : > { %2948 = shalt.err (!%p2945_p8)
}
 0x2ae   : > { %s2994_s29 = smov 128   ;;  %s2995_s9 = smov 8  }
 0x2af   : > { %2838 = dma.vmem_to_hbm [thread:$0]  (%p3074_p5), %s4140_s22, 1024, %s4145_s13, %s4151_s15, %s2994_s29, %s2994_s29, %s2995_s9  }
 0x2b0 PF: > { %p2850_p9 = scmp.ge.s32.totalorder %s2987_s27, 2  ;;  %s2017_s28 = sand.u32 1, %s2975_s24  }
 0x2b1   : > { %p4223_p10 = scmp.ne.s32.totalorder %s4201_s12, 0  ;;  %s2018_s14 = scalar_lea.sflag [#allocation5], %s2017_s28 }
 0x2b3   : > { %p2845_p11 = pnand %p2850_p9, %p4223_p10 }
 0x2b5   : > { %p2846_p12 = pneg %p2845_p11 }
 0x2b7   : > { %2970 = dma.done.wait (%p2846_p12), %s2018_s14, 1024  }
 0x2b8   : > { %2972 = vsyncadd (%p2846_p12), %s2018_s14, 4294966272  ;;  %p18_p13 = scmp.ge.s32.totalorder %s3061_s30, 4   ;;  %s4224_s24 = smov %s2979_s25 }
 0x2b9   : > { %s4225_s25 = smov %s2983_s26  ;;  %s4226_s26 = smov %s3072_s10 }
 0x2ba   : > { %s4227_s27 = smov %s3061_s30  ;;  %20 = sbr.rel (!%p18_p13) target bundleno = 4 (0x4), region = 96 }
 0x2bf   :  { %2023 = vsyncpa [#allocation4], 1 }
 0x2c0   :  { %2025 = vsyncpa [#allocation4 + $0x1], 1 }
 0x2c1   :  { %2026 = vsyncpa [#allocation5], 1 }
 0x2c2   :  { %2028 = vsyncpa [#allocation5 + $0x1], 1 }

</bundles_post_ra>
